<compile_context>
chip_gen: v5e
topology: v5e:2x2
jax: 0.10.0
libtpu: 0.0.40
codegen_flags: <defaults>
</compile_context>

<pallas_src>
import jax
import jax.numpy as jnp
from jax.experimental import pallas as pl
from jax.experimental.pallas import tpu as pltpu


# ----------------------------------------------------------------------------
# Static plan: spatial sizes, flat-row pitch and wide-row extents per layer.
# ----------------------------------------------------------------------------
def make_plan(h, w, cin, num_actions):
    assert h % 4 == 0 and w % 4 == 0, "stride-4 space-to-depth needs H, W % 4 == 0"
    assert 1 <= num_actions <= 128
    hs, ws = h // 4, w // 4          # spatial size after space-to-depth(4)
    pitch = ws                       # flat-row pitch shared by every layer
    oh1, ow1 = hs - 1, ws - 1        # conv1: k=8,s=4  ==  k=2,s=1 on the s2d input
    oh2, ow2 = (oh1 - 4) // 2 + 1, (ow1 - 4) // 2 + 1   # conv2: k=4, s=2
    oh3, ow3 = oh2 - 2, ow2 - 2                          # conv3: k=3, s=1
    assert oh1 >= 4 and ow1 >= 4 and oh3 >= 1 and ow3 >= 1

    # Wide-row extents: cover the valid output span AND the next layer's
    # shifted / strided tap reads (exact bounds, checked below).
    m3 = (oh3 - 1) * pitch + ow3
    m2 = max((oh2 - 1) * pitch + ow2, (m3 - 1) + 2 * pitch + 2 + 1)
    m1 = max((oh1 - 1) * pitch + ow1, 2 * (m2 - 1) + 3 * pitch + 3 + 1)
    m0 = max(hs * pitch, (m1 - 1) + pitch + 1 + 1)

    # read-bound sanity (all tap reads stay inside the producer's wide tile)
    assert (m1 - 1) + pitch + 1 <= m0 - 1
    assert 2 * (m2 - 1) + 3 * pitch + 3 <= m1 - 1
    assert (m3 - 1) + 2 * pitch + 2 <= m2 - 1

    rows3 = tuple(p * pitch + q for p in range(oh3) for q in range(ow3))
    return dict(h=h, w=w, cin=cin, hs=hs, ws=ws, pitch=pitch,
                oh1=oh1, ow1=ow1, oh2=oh2, ow2=ow2, oh3=oh3, ow3=ow3,
                m0=m0, m1=m1, m2=m2, m3=m3, rows3=rows3,
                cin_s2d=16 * cin, flat=64 * oh3 * ow3, num_actions=num_actions)


# ----------------------------------------------------------------------------
# One-time weight packing (outside the jitted forward).
# ----------------------------------------------------------------------------
def pack_params(params, plan, compute_dtype=jnp.bfloat16):
    cdt = compute_dtype
    f32 = jnp.float32
    cin = plan["cin"]

    # conv1 OIHW (32, cin, 8, 8) -> tap-major (4, 16*cin, 32), channel order
    # (r*4 + t)*cin + c matching the input space-to-depth layout.
    w1 = params["conv0_w"]
    co1 = w1.shape[0]
    w1 = w1.reshape(co1, cin, 2, 4, 2, 4)            # (co, c, i, r, j, t)
    w1 = w1.transpose(2, 4, 3, 5, 1, 0)              # (i, j, r, t, c, co)
    w1 = w1.reshape(4, 16 * cin, co1)                # tap = i*2 + j

    w2 = params["conv1_w"].transpose(2, 3, 1, 0).reshape(16, 32, 64)   # tap = i*4 + j
    w3 = params["conv2_w"].transpose(2, 3, 1, 0).reshape(9, 64, 64)    # tap = i*3 + j

    # fc0: PyTorch flattens NCHW (channel-major); the kernel gathers rows
    # spatial-major, so reorder once: w0[m, c, :] = fc0_w[c*S + m, :].
    S = plan["oh3"] * plan["ow3"]
    assert params["fc0_w"].shape[0] == plan["flat"]
    w0 = params["fc0_w"].reshape(64, S, 512).transpose(1, 0, 2)        # (S, 64, 512)

    a = plan["num_actions"]
    w4 = jnp.pad(params["fc1_w"], ((0, 0), (0, 128 - a)))              # (512, 128)
    b4 = jnp.pad(params["fc1_b"], (0, 128 - a))

    return dict(
        w1=w1.astype(cdt), b1=params["conv0_b"].reshape(1, -1).astype(f32),
        w2=w2.astype(cdt), b2=params["conv1_b"].reshape(1, -1).astype(f32),
        w3=w3.astype(cdt), b3=params["conv2_b"].reshape(1, -1).astype(f32),
        w0=w0.astype(cdt), b0=params["fc0_b"].reshape(1, -1).astype(f32),
        w4=w4.astype(cdt), b4=b4.reshape(1, -1).astype(f32),
    )


# ----------------------------------------------------------------------------
# Fused forward (single pallas_call over grid=(batch,)).
# ----------------------------------------------------------------------------
def build_dqn_forward(plan, compute_dtype=jnp.bfloat16):
    P = plan["pitch"]
    m0, m1, m2, m3 = plan["m0"], plan["m1"], plan["m2"], plan["m3"]
    rows3 = plan["rows3"]
    cin_s2d = plan["cin_s2d"]
    num_actions = plan["num_actions"]
    cdt = compute_dtype

    def kernel(x_ref, w1_ref, b1_ref, w2_ref, b2_ref, w3_ref, b3_ref,
               w0_ref, b0_ref, w4_ref, b4_ref, o_ref, y1_ref, y2_ref):
        f32 = jnp.float32

        def taps(k):
            return [(i, j) for i in range(k) for j in range(k)]

        # conv1: k=8,s=4 folded (via the input space-to-depth) to k=2,s=1.
        acc = None
        for t, (i, j) in enumerate(taps(2)):
            lhs = x_ref[pl.ds(i * P + j, m1), :]                       # (m1, 16*cin) bf16
            d = jnp.dot(lhs, w1_ref[t], preferred_element_type=f32)
            acc = d if acc is None else acc + d
        y1_ref[...] = jnp.maximum(acc + b1_ref[...], 0.0)              # (m1, 32) f32

        # conv2: k=4, s=2 -> stride-2 row windows of the wide y1 tile.
        acc = None
        for t, (i, j) in enumerate(taps(4)):
            lhs = y1_ref[pl.ds(i * P + j, m2, stride=2), :].astype(cdt)
            d = jnp.dot(lhs, w2_ref[t], preferred_element_type=f32)
            acc = d if acc is None else acc + d
        y2_ref[...] = jnp.maximum(acc + b2_ref[...], 0.0)              # (m2, 64) f32

        # conv3: k=3, s=1.
        acc = None
        for t, (i, j) in enumerate(taps(3)):
            lhs = y2_ref[pl.ds(i * P + j, m3), :].astype(cdt)
            d = jnp.dot(lhs, w3_ref[t], preferred_element_type=f32)
            acc = d if acc is None else acc + d
        y3 = jnp.maximum(acc + b3_ref[...], 0.0).astype(cdt)           # (m3, 64)

        # fc0: gather the oh3*ow3 valid rows (PyTorch flatten, reordered in
        # pack_params) and Linear(flat -> 512) + ReLU.
        h = None
        for m, r in enumerate(rows3):
            d = jnp.dot(y3[r:r + 1, :], w0_ref[m], preferred_element_type=f32)
            h = d if h is None else h + d
        h = jnp.maximum(h + b0_ref[...], 0.0).astype(cdt)              # (1, 512)

        # fc1: Linear(512 -> A) + ReLU (the PyTorch loop applies ReLU here too).
        q = jnp.dot(h, w4_ref[...], preferred_element_type=f32)
        q = jnp.maximum(q + b4_ref[...], 0.0)                          # (1, 128)
        o_ref[...] = jnp.broadcast_to(q, o_ref.shape).astype(o_ref.dtype)

    def forward(packed, states):
        b, cin, h, w = states.shape
        assert (h, w, cin) == (plan["h"], plan["w"], plan["cin"])
        hs, ws = plan["hs"], plan["ws"]

        # Input prep (the only XLA glue in the forward): cast -> NHWC ->
        # space-to-depth(4) -> flat rows.  ~60 KB of layout work per call.
        x = states.astype(cdt)
        x = jnp.transpose(x, (0, 2, 3, 1))                             # (B, H, W, C)
        x = x.reshape(b, hs, 4, ws, 4, cin).transpose(0, 1, 3, 2, 4, 5)
        x = x.reshape(b, hs * ws, cin_s2d)                             # (B, hs*ws, 16C)
        if m0 > hs * ws:                                               # tail for tap reads
            x = jnp.pad(x, ((0, 0), (0, m0 - hs * ws), (0, 0)))

        item = jnp.dtype(cdt).itemsize
        w_bytes = sum(v.size * v.dtype.itemsize for v in packed.values())
        blk_bytes = m0 * cin_s2d * item + w_bytes + 8 * 128 * 4        # one grid step
        scratch_bytes = (m1 * 32 + m2 * 64) * 4
        vmem_limit = int(2 * blk_bytes + scratch_bytes + (4 << 20))    # dbl-buffer + slack

        flops_per_sample = 2 * (4 * m1 * cin_s2d * 32 + 16 * m2 * 32 * 64
                                + 9 * m3 * 64 * 64 + plan["flat"] * 512 + 512 * 128)

        out = pl.pallas_call(
            kernel,
            out_shape=jax.ShapeDtypeStruct((b, 8, 128), jnp.float32),
            grid=(b,),
            in_specs=[
                pl.BlockSpec((None, m0, cin_s2d), lambda i: (i, 0, 0)),
                pl.BlockSpec(packed["w1"].shape, lambda i: (0, 0, 0)),
                pl.BlockSpec(packed["b1"].shape, lambda i: (0, 0)),
                pl.BlockSpec(packed["w2"].shape, lambda i: (0, 0, 0)),
                pl.BlockSpec(packed["b2"].shape, lambda i: (0, 0)),
                pl.BlockSpec(packed["w3"].shape, lambda i: (0, 0, 0)),
                pl.BlockSpec(packed["b3"].shape, lambda i: (0, 0)),
                pl.BlockSpec(packed["w0"].shape, lambda i: (0, 0, 0)),
                pl.BlockSpec(packed["b0"].shape, lambda i: (0, 0)),
                pl.BlockSpec(packed["w4"].shape, lambda i: (0, 0)),
                pl.BlockSpec(packed["b4"].shape, lambda i: (0, 0)),
            ],
            out_specs=pl.BlockSpec((None, 8, 128), lambda i: (i, 0, 0)),
            scratch_shapes=[
                pltpu.VMEM((m1, 32), jnp.float32),   # conv1 output (wide rows)
                pltpu.VMEM((m2, 64), jnp.float32),   # conv2 output (wide rows)
            ],
            compiler_params=pltpu.CompilerParams(
                dimension_semantics=("parallel",),
                vmem_limit_bytes=vmem_limit,
            ),
            cost_estimate=pl.CostEstimate(
                flops=int(b * flops_per_sample),
                transcendentals=0,
                bytes_accessed=int(b * m0 * cin_s2d * item + w_bytes + b * 8 * 128 * 4),
            ),
        )(x, packed["w1"], packed["b1"], packed["w2"], packed["b2"],
          packed["w3"], packed["b3"], packed["w0"], packed["b0"],
          packed["w4"], packed["b4"])

        # Only row 0 / the first num_actions lanes carry real data.
        return out[:, 0, :num_actions]

    return forward


# ----------------------------------------------------------------------------
# Parameter init (PyTorch layouts) + pure-JAX reference (PyTorch semantics).
# ----------------------------------------------------------------------------
def dqn_init_params(key, num_in_channels, h, w, number_of_actions):
    filters = [num_in_channels, 32, 64, 64]
    ksizes = [8, 4, 3]
    strides = [4, 2, 1]
    params = {}
    keys = jax.random.split(key, 10)
    ki = 0
    oh, ow = h, w
    for li in range(3):
        cin, cout, k = filters[li], filters[li + 1], ksizes[li]
        params[f"conv{li}_w"] = (
            jax.random.normal(keys[ki], (cout, cin, k, k), jnp.float32) * 0.05)
        ki += 1
        params[f"conv{li}_b"] = (
            jax.random.normal(keys[ki], (cout,), jnp.float32) * 0.01)
        ki += 1
        oh = (oh - k) // strides[li] + 1
        ow = (ow - k) // strides[li] + 1
    flat = filters[-1] * oh * ow
    fc_dims = [flat, 512, number_of_actions]
    for li in range(2):
        params[f"fc{li}_w"] = (
            jax.random.normal(keys[ki], (fc_dims[li], fc_dims[li + 1]), jnp.float32) * 0.05)
        ki += 1
        params[f"fc{li}_b"] = (
            jax.random.normal(keys[ki], (fc_dims[li + 1],), jnp.float32) * 0.01)
        ki += 1
    return params


def dqn_forward_ref(params, states):
    strides = [4, 2, 1]
    x = states
    for li in range(3):
        w = params[f"conv{li}_w"]
        b = params[f"conv{li}_b"]
        x = jax.lax.conv_general_dilated(
            x, w, window_strides=(strides[li], strides[li]), padding="VALID",
            dimension_numbers=("NCHW", "OIHW", "NCHW"),
        ) + b[None, :, None, None]
        x = jnp.maximum(x, 0.0)
    n = x.shape[0]
    x = x.reshape(n, -1)                               # NCHW flatten, as in PyTorch
    x = jnp.maximum(x @ params["fc0_w"] + params["fc0_b"], 0.0)
    x = jnp.maximum(x @ params["fc1_w"] + params["fc1_b"], 0.0)
    return x


if __name__ == "__main__":
    # Shapes consistent with the module: batch=2, 4 input channels, 44x44
    # spatial (conv stack -> 10 -> 4 -> 2 spatial, flat = 64*2*2 = 256).
    batch, cin, h, w = 2, 4, 44, 44
    number_of_actions = 3

    key = jax.random.PRNGKey(0)
    pkey, xkey = jax.random.split(key)
    params = dqn_init_params(pkey, cin, h, w, number_of_actions)
    states = jax.random.normal(xkey, (batch, cin, h, w), jnp.float32)

    plan = make_plan(h, w, cin, number_of_actions)

    # Weight packing happens once, outside the jitted forward (review item).
    packed_bf16 = pack_params(params, plan, jnp.bfloat16)
    packed_f32 = pack_params(params, plan, jnp.float32)

    fwd_bf16 = jax.jit(build_dqn_forward(plan, jnp.bfloat16))   # perf path
    fwd_f32 = jax.jit(build_dqn_forward(plan, jnp.float32))     # verification path

    out = jax.block_until_ready(fwd_bf16(packed_bf16, states))
    out_f32 = jax.block_until_ready(fwd_f32(packed_f32, states))
    ref = jax.block_until_ready(dqn_forward_ref(params, states))

    assert out.shape == (batch, number_of_actions), out.shape
    # f32 Pallas path vs XLA reference: tight tolerance.
    assert jnp.allclose(out_f32, ref, atol=1e-3, rtol=1e-3), (out_f32, ref)
    # bf16 MXU path (default perf mode): loose tolerance (bf16 operand rounding).
    assert jnp.allclose(out, ref, atol=5e-2, rtol=5e-2), (out, ref)

    print("KERNEL_OK")
</pallas_src>

<mosaic_0001>
module attributes {stable_mosaic.version = 11 : i64} {
  func.func @kernel(%arg0: i32, %arg1: memref<1x121x64xbf16, #tpu.memory_space<vmem>>, %arg2: memref<4x64x32xbf16, #tpu.memory_space<vmem>>, %arg3: memref<1x32xf32, #tpu.memory_space<vmem>>, %arg4: memref<16x32x64xbf16, #tpu.memory_space<vmem>>, %arg5: memref<1x64xf32, #tpu.memory_space<vmem>>, %arg6: memref<9x64x64xbf16, #tpu.memory_space<vmem>>, %arg7: memref<1x64xf32, #tpu.memory_space<vmem>>, %arg8: memref<4x64x512xbf16, #tpu.memory_space<vmem>>, %arg9: memref<1x512xf32, #tpu.memory_space<vmem>>, %arg10: memref<512x128xbf16, #tpu.memory_space<vmem>>, %arg11: memref<1x128xf32, #tpu.memory_space<vmem>>, %arg12: memref<1x8x128xf32, #tpu.memory_space<vmem>>, %arg13: memref<109x32xf32, #tpu.memory_space<vmem>>, %arg14: memref<37x64xf32, #tpu.memory_space<vmem>>) attributes {dimension_semantics = [#tpu.dimension_semantics<parallel>], iteration_bounds = array<i64: 2>, scalar_prefetch = 0 : i64, scratch_operands = 2 : i64, tpu.core_type = #tpu.core_type<tc>, window_params = [{transform_indices = @transform_0, window_bounds = array<i64: 1, 121, 64>}, {pipeline_mode = #tpu.pipeline_mode<synchronous>, transform_indices = @transform_1, window_bounds = array<i64: 4, 64, 32>}, {pipeline_mode = #tpu.pipeline_mode<synchronous>, transform_indices = @transform_2, window_bounds = array<i64: 1, 32>}, {pipeline_mode = #tpu.pipeline_mode<synchronous>, transform_indices = @transform_3, window_bounds = array<i64: 16, 32, 64>}, {pipeline_mode = #tpu.pipeline_mode<synchronous>, transform_indices = @transform_4, window_bounds = array<i64: 1, 64>}, {pipeline_mode = #tpu.pipeline_mode<synchronous>, transform_indices = @transform_5, window_bounds = array<i64: 9, 64, 64>}, {pipeline_mode = #tpu.pipeline_mode<synchronous>, transform_indices = @transform_6, window_bounds = array<i64: 1, 64>}, {pipeline_mode = #tpu.pipeline_mode<synchronous>, transform_indices = @transform_7, window_bounds = array<i64: 4, 64, 512>}, {pipeline_mode = #tpu.pipeline_mode<synchronous>, transform_indices = @transform_8, window_bounds = array<i64: 1, 512>}, {pipeline_mode = #tpu.pipeline_mode<synchronous>, transform_indices = @transform_9, window_bounds = array<i64: 512, 128>}, {pipeline_mode = #tpu.pipeline_mode<synchronous>, transform_indices = @transform_10, window_bounds = array<i64: 1, 128>}, {transform_indices = @transform_11, window_bounds = array<i64: 1, 8, 128>}]} {
    %c0 = arith.constant 0 : index
    %c0_0 = arith.constant 0 : index
    %c0_1 = arith.constant 0 : index
    %0 = vector.load %arg1[%c0, %c0_0, %c0_1] : memref<1x121x64xbf16, #tpu.memory_space<vmem>>, vector<1x109x64xbf16>
    %1 = vector.shape_cast %0 : vector<1x109x64xbf16> to vector<109x64xbf16>
    %c0_2 = arith.constant 0 : index
    %c0_3 = arith.constant 0 : index
    %c0_4 = arith.constant 0 : index
    %2 = vector.load %arg2[%c0_2, %c0_3, %c0_4] : memref<4x64x32xbf16, #tpu.memory_space<vmem>>, vector<1x64x32xbf16>
    %3 = vector.shape_cast %2 : vector<1x64x32xbf16> to vector<64x32xbf16>
    %cst = arith.constant dense<0.000000e+00> : vector<109x32xf32>
    %4 = tpu.matmul %1, %3, %cst {dimension_numbers = #tpu.dot_dimension_numbers<[1], [0], [0], [1], [0, 0, 1, 1], [], []>} : vector<109x64xbf16>, vector<64x32xbf16>, vector<109x32xf32> -> vector<109x32xf32>
    %c0_5 = arith.constant 0 : index
    %c1 = arith.constant 1 : index
    %c0_6 = arith.constant 0 : index
    %5 = vector.load %arg1[%c0_5, %c1, %c0_6] : memref<1x121x64xbf16, #tpu.memory_space<vmem>>, vector<1x109x64xbf16>
    %6 = vector.shape_cast %5 : vector<1x109x64xbf16> to vector<109x64xbf16>
    %c1_7 = arith.constant 1 : index
    %c0_8 = arith.constant 0 : index
    %c0_9 = arith.constant 0 : index
    %7 = vector.load %arg2[%c1_7, %c0_8, %c0_9] : memref<4x64x32xbf16, #tpu.memory_space<vmem>>, vector<1x64x32xbf16>
    %8 = vector.shape_cast %7 : vector<1x64x32xbf16> to vector<64x32xbf16>
    %cst_10 = arith.constant dense<0.000000e+00> : vector<109x32xf32>
    %9 = tpu.matmul %6, %8, %cst_10 {dimension_numbers = #tpu.dot_dimension_numbers<[1], [0], [0], [1], [0, 0, 1, 1], [], []>} : vector<109x64xbf16>, vector<64x32xbf16>, vector<109x32xf32> -> vector<109x32xf32>
    %10 = arith.addf %4, %9 : vector<109x32xf32>
    %c0_11 = arith.constant 0 : index
    %c11 = arith.constant 11 : index
    %c0_12 = arith.constant 0 : index
    %11 = vector.load %arg1[%c0_11, %c11, %c0_12] : memref<1x121x64xbf16, #tpu.memory_space<vmem>>, vector<1x109x64xbf16>
    %12 = vector.shape_cast %11 : vector<1x109x64xbf16> to vector<109x64xbf16>
    %c2 = arith.constant 2 : index
    %c0_13 = arith.constant 0 : index
    %c0_14 = arith.constant 0 : index
    %13 = vector.load %arg2[%c2, %c0_13, %c0_14] : memref<4x64x32xbf16, #tpu.memory_space<vmem>>, vector<1x64x32xbf16>
    %14 = vector.shape_cast %13 : vector<1x64x32xbf16> to vector<64x32xbf16>
    %cst_15 = arith.constant dense<0.000000e+00> : vector<109x32xf32>
    %15 = tpu.matmul %12, %14, %cst_15 {dimension_numbers = #tpu.dot_dimension_numbers<[1], [0], [0], [1], [0, 0, 1, 1], [], []>} : vector<109x64xbf16>, vector<64x32xbf16>, vector<109x32xf32> -> vector<109x32xf32>
    %16 = arith.addf %10, %15 : vector<109x32xf32>
    %c0_16 = arith.constant 0 : index
    %c12 = arith.constant 12 : index
    %c0_17 = arith.constant 0 : index
    %17 = vector.load %arg1[%c0_16, %c12, %c0_17] : memref<1x121x64xbf16, #tpu.memory_space<vmem>>, vector<1x109x64xbf16>
    %18 = vector.shape_cast %17 : vector<1x109x64xbf16> to vector<109x64xbf16>
    %c3 = arith.constant 3 : index
    %c0_18 = arith.constant 0 : index
    %c0_19 = arith.constant 0 : index
    %19 = vector.load %arg2[%c3, %c0_18, %c0_19] : memref<4x64x32xbf16, #tpu.memory_space<vmem>>, vector<1x64x32xbf16>
    %20 = vector.shape_cast %19 : vector<1x64x32xbf16> to vector<64x32xbf16>
    %cst_20 = arith.constant dense<0.000000e+00> : vector<109x32xf32>
    %21 = tpu.matmul %18, %20, %cst_20 {dimension_numbers = #tpu.dot_dimension_numbers<[1], [0], [0], [1], [0, 0, 1, 1], [], []>} : vector<109x64xbf16>, vector<64x32xbf16>, vector<109x32xf32> -> vector<109x32xf32>
    %22 = arith.addf %16, %21 : vector<109x32xf32>
    %c0_21 = arith.constant 0 : index
    %c0_22 = arith.constant 0 : index
    %23 = vector.load %arg3[%c0_21, %c0_22] : memref<1x32xf32, #tpu.memory_space<vmem>>, vector<1x32xf32>
    %24 = vector.broadcast %23 : vector<1x32xf32> to vector<109x32xf32>
    %25 = arith.addf %22, %24 : vector<109x32xf32>
    %cst_23 = arith.constant 0.000000e+00 : f32
    %26 = vector.broadcast %cst_23 : f32 to vector<109x32xf32>
    %27 = arith.maximumf %25, %26 : vector<109x32xf32>
    %c0_24 = arith.constant 0 : index
    %c0_25 = arith.constant 0 : index
    %28 = vector.load %arg13[%c0_24, %c0_25] : memref<109x32xf32, #tpu.memory_space<vmem>>, vector<109x32xf32>
    tpu.vector_store %arg13[%c0_24, %c0_25], %27 {strides = array<i32>} : memref<109x32xf32, #tpu.memory_space<vmem>>, vector<109x32xf32>,
    %c0_26 = arith.constant 0 : index
    %c0_27 = arith.constant 0 : index
    %29 = tpu.strided_load %arg13[%c0_26, %c0_27] {strides = array<i32: 2, 1>} : memref<109x32xf32, #tpu.memory_space<vmem>>, vector<37x32xf32>
    %30 = arith.truncf %29 : vector<37x32xf32> to vector<37x32xbf16>
    %c0_28 = arith.constant 0 : index
    %c0_29 = arith.constant 0 : index
    %c0_30 = arith.constant 0 : index
    %31 = vector.load %arg4[%c0_28, %c0_29, %c0_30] : memref<16x32x64xbf16, #tpu.memory_space<vmem>>, vector<1x32x64xbf16>
    %32 = vector.shape_cast %31 : vector<1x32x64xbf16> to vector<32x64xbf16>
    %cst_31 = arith.constant dense<0.000000e+00> : vector<37x64xf32>
    %33 = tpu.matmul %30, %32, %cst_31 {dimension_numbers = #tpu.dot_dimension_numbers<[1], [0], [0], [1], [0, 0, 1, 1], [], []>} : vector<37x32xbf16>, vector<32x64xbf16>, vector<37x64xf32> -> vector<37x64xf32>
    %c1_32 = arith.constant 1 : index
    %c0_33 = arith.constant 0 : index
    %34 = tpu.strided_load %arg13[%c1_32, %c0_33] {strides = array<i32: 2, 1>} : memref<109x32xf32, #tpu.memory_space<vmem>>, vector<37x32xf32>
    %35 = arith.truncf %34 : vector<37x32xf32> to vector<37x32xbf16>
    %c1_34 = arith.constant 1 : index
    %c0_35 = arith.constant 0 : index
    %c0_36 = arith.constant 0 : index
    %36 = vector.load %arg4[%c1_34, %c0_35, %c0_36] : memref<16x32x64xbf16, #tpu.memory_space<vmem>>, vector<1x32x64xbf16>
    %37 = vector.shape_cast %36 : vector<1x32x64xbf16> to vector<32x64xbf16>
    %cst_37 = arith.constant dense<0.000000e+00> : vector<37x64xf32>
    %38 = tpu.matmul %35, %37, %cst_37 {dimension_numbers = #tpu.dot_dimension_numbers<[1], [0], [0], [1], [0, 0, 1, 1], [], []>} : vector<37x32xbf16>, vector<32x64xbf16>, vector<37x64xf32> -> vector<37x64xf32>
    %39 = arith.addf %33, %38 : vector<37x64xf32>
    %c2_38 = arith.constant 2 : index
    %c0_39 = arith.constant 0 : index
    %40 = tpu.strided_load %arg13[%c2_38, %c0_39] {strides = array<i32: 2, 1>} : memref<109x32xf32, #tpu.memory_space<vmem>>, vector<37x32xf32>
    %41 = arith.truncf %40 : vector<37x32xf32> to vector<37x32xbf16>
    %c2_40 = arith.constant 2 : index
    %c0_41 = arith.constant 0 : index
    %c0_42 = arith.constant 0 : index
    %42 = vector.load %arg4[%c2_40, %c0_41, %c0_42] : memref<16x32x64xbf16, #tpu.memory_space<vmem>>, vector<1x32x64xbf16>
    %43 = vector.shape_cast %42 : vector<1x32x64xbf16> to vector<32x64xbf16>
    %cst_43 = arith.constant dense<0.000000e+00> : vector<37x64xf32>
    %44 = tpu.matmul %41, %43, %cst_43 {dimension_numbers = #tpu.dot_dimension_numbers<[1], [0], [0], [1], [0, 0, 1, 1], [], []>} : vector<37x32xbf16>, vector<32x64xbf16>, vector<37x64xf32> -> vector<37x64xf32>
    %45 = arith.addf %39, %44 : vector<37x64xf32>
    %c3_44 = arith.constant 3 : index
    %c0_45 = arith.constant 0 : index
    %46 = tpu.strided_load %arg13[%c3_44, %c0_45] {strides = array<i32: 2, 1>} : memref<109x32xf32, #tpu.memory_space<vmem>>, vector<37x32xf32>
    %47 = arith.truncf %46 : vector<37x32xf32> to vector<37x32xbf16>
    %c3_46 = arith.constant 3 : index
    %c0_47 = arith.constant 0 : index
    %c0_48 = arith.constant 0 : index
    %48 = vector.load %arg4[%c3_46, %c0_47, %c0_48] : memref<16x32x64xbf16, #tpu.memory_space<vmem>>, vector<1x32x64xbf16>
    %49 = vector.shape_cast %48 : vector<1x32x64xbf16> to vector<32x64xbf16>
    %cst_49 = arith.constant dense<0.000000e+00> : vector<37x64xf32>
    %50 = tpu.matmul %47, %49, %cst_49 {dimension_numbers = #tpu.dot_dimension_numbers<[1], [0], [0], [1], [0, 0, 1, 1], [], []>} : vector<37x32xbf16>, vector<32x64xbf16>, vector<37x64xf32> -> vector<37x64xf32>
    %51 = arith.addf %45, %50 : vector<37x64xf32>
    %c11_50 = arith.constant 11 : index
    %c0_51 = arith.constant 0 : index
    %52 = tpu.strided_load %arg13[%c11_50, %c0_51] {strides = array<i32: 2, 1>} : memref<109x32xf32, #tpu.memory_space<vmem>>, vector<37x32xf32>
    %53 = arith.truncf %52 : vector<37x32xf32> to vector<37x32xbf16>
    %c4 = arith.constant 4 : index
    %c0_52 = arith.constant 0 : index
    %c0_53 = arith.constant 0 : index
    %54 = vector.load %arg4[%c4, %c0_52, %c0_53] : memref<16x32x64xbf16, #tpu.memory_space<vmem>>, vector<1x32x64xbf16>
    %55 = vector.shape_cast %54 : vector<1x32x64xbf16> to vector<32x64xbf16>
    %cst_54 = arith.constant dense<0.000000e+00> : vector<37x64xf32>
    %56 = tpu.matmul %53, %55, %cst_54 {dimension_numbers = #tpu.dot_dimension_numbers<[1], [0], [0], [1], [0, 0, 1, 1], [], []>} : vector<37x32xbf16>, vector<32x64xbf16>, vector<37x64xf32> -> vector<37x64xf32>
    %57 = arith.addf %51, %56 : vector<37x64xf32>
    %c12_55 = arith.constant 12 : index
    %c0_56 = arith.constant 0 : index
    %58 = tpu.strided_load %arg13[%c12_55, %c0_56] {strides = array<i32: 2, 1>} : memref<109x32xf32, #tpu.memory_space<vmem>>, vector<37x32xf32>
    %59 = arith.truncf %58 : vector<37x32xf32> to vector<37x32xbf16>
    %c5 = arith.constant 5 : index
    %c0_57 = arith.constant 0 : index
    %c0_58 = arith.constant 0 : index
    %60 = vector.load %arg4[%c5, %c0_57, %c0_58] : memref<16x32x64xbf16, #tpu.memory_space<vmem>>, vector<1x32x64xbf16>
    %61 = vector.shape_cast %60 : vector<1x32x64xbf16> to vector<32x64xbf16>
    %cst_59 = arith.constant dense<0.000000e+00> : vector<37x64xf32>
    %62 = tpu.matmul %59, %61, %cst_59 {dimension_numbers = #tpu.dot_dimension_numbers<[1], [0], [0], [1], [0, 0, 1, 1], [], []>} : vector<37x32xbf16>, vector<32x64xbf16>, vector<37x64xf32> -> vector<37x64xf32>
    %63 = arith.addf %57, %62 : vector<37x64xf32>
    %c13 = arith.constant 13 : index
    %c0_60 = arith.constant 0 : index
    %64 = tpu.strided_load %arg13[%c13, %c0_60] {strides = array<i32: 2, 1>} : memref<109x32xf32, #tpu.memory_space<vmem>>, vector<37x32xf32>
    %65 = arith.truncf %64 : vector<37x32xf32> to vector<37x32xbf16>
    %c6 = arith.constant 6 : index
    %c0_61 = arith.constant 0 : index
    %c0_62 = arith.constant 0 : index
    %66 = vector.load %arg4[%c6, %c0_61, %c0_62] : memref<16x32x64xbf16, #tpu.memory_space<vmem>>, vector<1x32x64xbf16>
    %67 = vector.shape_cast %66 : vector<1x32x64xbf16> to vector<32x64xbf16>
    %cst_63 = arith.constant dense<0.000000e+00> : vector<37x64xf32>
    %68 = tpu.matmul %65, %67, %cst_63 {dimension_numbers = #tpu.dot_dimension_numbers<[1], [0], [0], [1], [0, 0, 1, 1], [], []>} : vector<37x32xbf16>, vector<32x64xbf16>, vector<37x64xf32> -> vector<37x64xf32>
    %69 = arith.addf %63, %68 : vector<37x64xf32>
    %c14 = arith.constant 14 : index
    %c0_64 = arith.constant 0 : index
    %70 = tpu.strided_load %arg13[%c14, %c0_64] {strides = array<i32: 2, 1>} : memref<109x32xf32, #tpu.memory_space<vmem>>, vector<37x32xf32>
    %71 = arith.truncf %70 : vector<37x32xf32> to vector<37x32xbf16>
    %c7 = arith.constant 7 : index
    %c0_65 = arith.constant 0 : index
    %c0_66 = arith.constant 0 : index
    %72 = vector.load %arg4[%c7, %c0_65, %c0_66] : memref<16x32x64xbf16, #tpu.memory_space<vmem>>, vector<1x32x64xbf16>
    %73 = vector.shape_cast %72 : vector<1x32x64xbf16> to vector<32x64xbf16>
    %cst_67 = arith.constant dense<0.000000e+00> : vector<37x64xf32>
    %74 = tpu.matmul %71, %73, %cst_67 {dimension_numbers = #tpu.dot_dimension_numbers<[1], [0], [0], [1], [0, 0, 1, 1], [], []>} : vector<37x32xbf16>, vector<32x64xbf16>, vector<37x64xf32> -> vector<37x64xf32>
    %75 = arith.addf %69, %74 : vector<37x64xf32>
    %c22 = arith.constant 22 : index
    %c0_68 = arith.constant 0 : index
    %76 = tpu.strided_load %arg13[%c22, %c0_68] {strides = array<i32: 2, 1>} : memref<109x32xf32, #tpu.memory_space<vmem>>, vector<37x32xf32>
    %77 = arith.truncf %76 : vector<37x32xf32> to vector<37x32xbf16>
    %c8 = arith.constant 8 : index
    %c0_69 = arith.constant 0 : index
    %c0_70 = arith.constant 0 : index
    %78 = vector.load %arg4[%c8, %c0_69, %c0_70] : memref<16x32x64xbf16, #tpu.memory_space<vmem>>, vector<1x32x64xbf16>
    %79 = vector.shape_cast %78 : vector<1x32x64xbf16> to vector<32x64xbf16>
    %cst_71 = arith.constant dense<0.000000e+00> : vector<37x64xf32>
    %80 = tpu.matmul %77, %79, %cst_71 {dimension_numbers = #tpu.dot_dimension_numbers<[1], [0], [0], [1], [0, 0, 1, 1], [], []>} : vector<37x32xbf16>, vector<32x64xbf16>, vector<37x64xf32> -> vector<37x64xf32>
    %81 = arith.addf %75, %80 : vector<37x64xf32>
    %c23 = arith.constant 23 : index
    %c0_72 = arith.constant 0 : index
    %82 = tpu.strided_load %arg13[%c23, %c0_72] {strides = array<i32: 2, 1>} : memref<109x32xf32, #tpu.memory_space<vmem>>, vector<37x32xf32>
    %83 = arith.truncf %82 : vector<37x32xf32> to vector<37x32xbf16>
    %c9 = arith.constant 9 : index
    %c0_73 = arith.constant 0 : index
    %c0_74 = arith.constant 0 : index
    %84 = vector.load %arg4[%c9, %c0_73, %c0_74] : memref<16x32x64xbf16, #tpu.memory_space<vmem>>, vector<1x32x64xbf16>
    %85 = vector.shape_cast %84 : vector<1x32x64xbf16> to vector<32x64xbf16>
    %cst_75 = arith.constant dense<0.000000e+00> : vector<37x64xf32>
    %86 = tpu.matmul %83, %85, %cst_75 {dimension_numbers = #tpu.dot_dimension_numbers<[1], [0], [0], [1], [0, 0, 1, 1], [], []>} : vector<37x32xbf16>, vector<32x64xbf16>, vector<37x64xf32> -> vector<37x64xf32>
    %87 = arith.addf %81, %86 : vector<37x64xf32>
    %c24 = arith.constant 24 : index
    %c0_76 = arith.constant 0 : index
    %88 = tpu.strided_load %arg13[%c24, %c0_76] {strides = array<i32: 2, 1>} : memref<109x32xf32, #tpu.memory_space<vmem>>, vector<37x32xf32>
    %89 = arith.truncf %88 : vector<37x32xf32> to vector<37x32xbf16>
    %c10 = arith.constant 10 : index
    %c0_77 = arith.constant 0 : index
    %c0_78 = arith.constant 0 : index
    %90 = vector.load %arg4[%c10, %c0_77, %c0_78] : memref<16x32x64xbf16, #tpu.memory_space<vmem>>, vector<1x32x64xbf16>
    %91 = vector.shape_cast %90 : vector<1x32x64xbf16> to vector<32x64xbf16>
    %cst_79 = arith.constant dense<0.000000e+00> : vector<37x64xf32>
    %92 = tpu.matmul %89, %91, %cst_79 {dimension_numbers = #tpu.dot_dimension_numbers<[1], [0], [0], [1], [0, 0, 1, 1], [], []>} : vector<37x32xbf16>, vector<32x64xbf16>, vector<37x64xf32> -> vector<37x64xf32>
    %93 = arith.addf %87, %92 : vector<37x64xf32>
    %c25 = arith.constant 25 : index
    %c0_80 = arith.constant 0 : index
    %94 = tpu.strided_load %arg13[%c25, %c0_80] {strides = array<i32: 2, 1>} : memref<109x32xf32, #tpu.memory_space<vmem>>, vector<37x32xf32>
    %95 = arith.truncf %94 : vector<37x32xf32> to vector<37x32xbf16>
    %c11_81 = arith.constant 11 : index
    %c0_82 = arith.constant 0 : index
    %c0_83 = arith.constant 0 : index
    %96 = vector.load %arg4[%c11_81, %c0_82, %c0_83] : memref<16x32x64xbf16, #tpu.memory_space<vmem>>, vector<1x32x64xbf16>
    %97 = vector.shape_cast %96 : vector<1x32x64xbf16> to vector<32x64xbf16>
    %cst_84 = arith.constant dense<0.000000e+00> : vector<37x64xf32>
    %98 = tpu.matmul %95, %97, %cst_84 {dimension_numbers = #tpu.dot_dimension_numbers<[1], [0], [0], [1], [0, 0, 1, 1], [], []>} : vector<37x32xbf16>, vector<32x64xbf16>, vector<37x64xf32> -> vector<37x64xf32>
    %99 = arith.addf %93, %98 : vector<37x64xf32>
    %c33 = arith.constant 33 : index
    %c0_85 = arith.constant 0 : index
    %100 = tpu.strided_load %arg13[%c33, %c0_85] {strides = array<i32: 2, 1>} : memref<109x32xf32, #tpu.memory_space<vmem>>, vector<37x32xf32>
    %101 = arith.truncf %100 : vector<37x32xf32> to vector<37x32xbf16>
    %c12_86 = arith.constant 12 : index
    %c0_87 = arith.constant 0 : index
    %c0_88 = arith.constant 0 : index
    %102 = vector.load %arg4[%c12_86, %c0_87, %c0_88] : memref<16x32x64xbf16, #tpu.memory_space<vmem>>, vector<1x32x64xbf16>
    %103 = vector.shape_cast %102 : vector<1x32x64xbf16> to vector<32x64xbf16>
    %cst_89 = arith.constant dense<0.000000e+00> : vector<37x64xf32>
    %104 = tpu.matmul %101, %103, %cst_89 {dimension_numbers = #tpu.dot_dimension_numbers<[1], [0], [0], [1], [0, 0, 1, 1], [], []>} : vector<37x32xbf16>, vector<32x64xbf16>, vector<37x64xf32> -> vector<37x64xf32>
    %105 = arith.addf %99, %104 : vector<37x64xf32>
    %c34 = arith.constant 34 : index
    %c0_90 = arith.constant 0 : index
    %106 = tpu.strided_load %arg13[%c34, %c0_90] {strides = array<i32: 2, 1>} : memref<109x32xf32, #tpu.memory_space<vmem>>, vector<37x32xf32>
    %107 = arith.truncf %106 : vector<37x32xf32> to vector<37x32xbf16>
    %c13_91 = arith.constant 13 : index
    %c0_92 = arith.constant 0 : index
    %c0_93 = arith.constant 0 : index
    %108 = vector.load %arg4[%c13_91, %c0_92, %c0_93] : memref<16x32x64xbf16, #tpu.memory_space<vmem>>, vector<1x32x64xbf16>
    %109 = vector.shape_cast %108 : vector<1x32x64xbf16> to vector<32x64xbf16>
    %cst_94 = arith.constant dense<0.000000e+00> : vector<37x64xf32>
    %110 = tpu.matmul %107, %109, %cst_94 {dimension_numbers = #tpu.dot_dimension_numbers<[1], [0], [0], [1], [0, 0, 1, 1], [], []>} : vector<37x32xbf16>, vector<32x64xbf16>, vector<37x64xf32> -> vector<37x64xf32>
    %111 = arith.addf %105, %110 : vector<37x64xf32>
    %c35 = arith.constant 35 : index
    %c0_95 = arith.constant 0 : index
    %112 = tpu.strided_load %arg13[%c35, %c0_95] {strides = array<i32: 2, 1>} : memref<109x32xf32, #tpu.memory_space<vmem>>, vector<37x32xf32>
    %113 = arith.truncf %112 : vector<37x32xf32> to vector<37x32xbf16>
    %c14_96 = arith.constant 14 : index
    %c0_97 = arith.constant 0 : index
    %c0_98 = arith.constant 0 : index
    %114 = vector.load %arg4[%c14_96, %c0_97, %c0_98] : memref<16x32x64xbf16, #tpu.memory_space<vmem>>, vector<1x32x64xbf16>
    %115 = vector.shape_cast %114 : vector<1x32x64xbf16> to vector<32x64xbf16>
    %cst_99 = arith.constant dense<0.000000e+00> : vector<37x64xf32>
    %116 = tpu.matmul %113, %115, %cst_99 {dimension_numbers = #tpu.dot_dimension_numbers<[1], [0], [0], [1], [0, 0, 1, 1], [], []>} : vector<37x32xbf16>, vector<32x64xbf16>, vector<37x64xf32> -> vector<37x64xf32>
    %117 = arith.addf %111, %116 : vector<37x64xf32>
    %c36 = arith.constant 36 : index
    %c0_100 = arith.constant 0 : index
    %118 = tpu.strided_load %arg13[%c36, %c0_100] {strides = array<i32: 2, 1>} : memref<109x32xf32, #tpu.memory_space<vmem>>, vector<37x32xf32>
    %119 = arith.truncf %118 : vector<37x32xf32> to vector<37x32xbf16>
    %c15 = arith.constant 15 : index
    %c0_101 = arith.constant 0 : index
    %c0_102 = arith.constant 0 : index
    %120 = vector.load %arg4[%c15, %c0_101, %c0_102] : memref<16x32x64xbf16, #tpu.memory_space<vmem>>, vector<1x32x64xbf16>
    %121 = vector.shape_cast %120 : vector<1x32x64xbf16> to vector<32x64xbf16>
    %cst_103 = arith.constant dense<0.000000e+00> : vector<37x64xf32>
    %122 = tpu.matmul %119, %121, %cst_103 {dimension_numbers = #tpu.dot_dimension_numbers<[1], [0], [0], [1], [0, 0, 1, 1], [], []>} : vector<37x32xbf16>, vector<32x64xbf16>, vector<37x64xf32> -> vector<37x64xf32>
    %123 = arith.addf %117, %122 : vector<37x64xf32>
    %c0_104 = arith.constant 0 : index
    %c0_105 = arith.constant 0 : index
    %124 = vector.load %arg5[%c0_104, %c0_105] : memref<1x64xf32, #tpu.memory_space<vmem>>, vector<1x64xf32>
    %125 = vector.broadcast %124 : vector<1x64xf32> to vector<37x64xf32>
    %126 = arith.addf %123, %125 : vector<37x64xf32>
    %cst_106 = arith.constant 0.000000e+00 : f32
    %127 = vector.broadcast %cst_106 : f32 to vector<37x64xf32>
    %128 = arith.maximumf %126, %127 : vector<37x64xf32>
    %c0_107 = arith.constant 0 : index
    %c0_108 = arith.constant 0 : index
    %129 = vector.load %arg14[%c0_107, %c0_108] : memref<37x64xf32, #tpu.memory_space<vmem>>, vector<37x64xf32>
    tpu.vector_store %arg14[%c0_107, %c0_108], %128 {strides = array<i32>} : memref<37x64xf32, #tpu.memory_space<vmem>>, vector<37x64xf32>,
    %c0_109 = arith.constant 0 : index
    %c0_110 = arith.constant 0 : index
    %130 = vector.load %arg14[%c0_109, %c0_110] : memref<37x64xf32, #tpu.memory_space<vmem>>, vector<13x64xf32>
    %131 = arith.truncf %130 : vector<13x64xf32> to vector<13x64xbf16>
    %c0_111 = arith.constant 0 : index
    %c0_112 = arith.constant 0 : index
    %c0_113 = arith.constant 0 : index
    %132 = vector.load %arg6[%c0_111, %c0_112, %c0_113] : memref<9x64x64xbf16, #tpu.memory_space<vmem>>, vector<1x64x64xbf16>
    %133 = vector.shape_cast %132 : vector<1x64x64xbf16> to vector<64x64xbf16>
    %cst_114 = arith.constant dense<0.000000e+00> : vector<13x64xf32>
    %134 = tpu.matmul %131, %133, %cst_114 {dimension_numbers = #tpu.dot_dimension_numbers<[1], [0], [0], [1], [0, 0, 1, 1], [], []>} : vector<13x64xbf16>, vector<64x64xbf16>, vector<13x64xf32> -> vector<13x64xf32>
    %c1_115 = arith.constant 1 : index
    %c0_116 = arith.constant 0 : index
    %135 = vector.load %arg14[%c1_115, %c0_116] : memref<37x64xf32, #tpu.memory_space<vmem>>, vector<13x64xf32>
    %136 = arith.truncf %135 : vector<13x64xf32> to vector<13x64xbf16>
    %c1_117 = arith.constant 1 : index
    %c0_118 = arith.constant 0 : index
    %c0_119 = arith.constant 0 : index
    %137 = vector.load %arg6[%c1_117, %c0_118, %c0_119] : memref<9x64x64xbf16, #tpu.memory_space<vmem>>, vector<1x64x64xbf16>
    %138 = vector.shape_cast %137 : vector<1x64x64xbf16> to vector<64x64xbf16>
    %cst_120 = arith.constant dense<0.000000e+00> : vector<13x64xf32>
    %139 = tpu.matmul %136, %138, %cst_120 {dimension_numbers = #tpu.dot_dimension_numbers<[1], [0], [0], [1], [0, 0, 1, 1], [], []>} : vector<13x64xbf16>, vector<64x64xbf16>, vector<13x64xf32> -> vector<13x64xf32>
    %140 = arith.addf %134, %139 : vector<13x64xf32>
    %c2_121 = arith.constant 2 : index
    %c0_122 = arith.constant 0 : index
    %141 = vector.load %arg14[%c2_121, %c0_122] : memref<37x64xf32, #tpu.memory_space<vmem>>, vector<13x64xf32>
    %142 = arith.truncf %141 : vector<13x64xf32> to vector<13x64xbf16>
    %c2_123 = arith.constant 2 : index
    %c0_124 = arith.constant 0 : index
    %c0_125 = arith.constant 0 : index
    %143 = vector.load %arg6[%c2_123, %c0_124, %c0_125] : memref<9x64x64xbf16, #tpu.memory_space<vmem>>, vector<1x64x64xbf16>
    %144 = vector.shape_cast %143 : vector<1x64x64xbf16> to vector<64x64xbf16>
    %cst_126 = arith.constant dense<0.000000e+00> : vector<13x64xf32>
    %145 = tpu.matmul %142, %144, %cst_126 {dimension_numbers = #tpu.dot_dimension_numbers<[1], [0], [0], [1], [0, 0, 1, 1], [], []>} : vector<13x64xbf16>, vector<64x64xbf16>, vector<13x64xf32> -> vector<13x64xf32>
    %146 = arith.addf %140, %145 : vector<13x64xf32>
    %c11_127 = arith.constant 11 : index
    %c0_128 = arith.constant 0 : index
    %147 = vector.load %arg14[%c11_127, %c0_128] : memref<37x64xf32, #tpu.memory_space<vmem>>, vector<13x64xf32>
    %148 = arith.truncf %147 : vector<13x64xf32> to vector<13x64xbf16>
    %c3_129 = arith.constant 3 : index
    %c0_130 = arith.constant 0 : index
    %c0_131 = arith.constant 0 : index
    %149 = vector.load %arg6[%c3_129, %c0_130, %c0_131] : memref<9x64x64xbf16, #tpu.memory_space<vmem>>, vector<1x64x64xbf16>
    %150 = vector.shape_cast %149 : vector<1x64x64xbf16> to vector<64x64xbf16>
    %cst_132 = arith.constant dense<0.000000e+00> : vector<13x64xf32>
    %151 = tpu.matmul %148, %150, %cst_132 {dimension_numbers = #tpu.dot_dimension_numbers<[1], [0], [0], [1], [0, 0, 1, 1], [], []>} : vector<13x64xbf16>, vector<64x64xbf16>, vector<13x64xf32> -> vector<13x64xf32>
    %152 = arith.addf %146, %151 : vector<13x64xf32>
    %c12_133 = arith.constant 12 : index
    %c0_134 = arith.constant 0 : index
    %153 = vector.load %arg14[%c12_133, %c0_134] : memref<37x64xf32, #tpu.memory_space<vmem>>, vector<13x64xf32>
    %154 = arith.truncf %153 : vector<13x64xf32> to vector<13x64xbf16>
    %c4_135 = arith.constant 4 : index
    %c0_136 = arith.constant 0 : index
    %c0_137 = arith.constant 0 : index
    %155 = vector.load %arg6[%c4_135, %c0_136, %c0_137] : memref<9x64x64xbf16, #tpu.memory_space<vmem>>, vector<1x64x64xbf16>
    %156 = vector.shape_cast %155 : vector<1x64x64xbf16> to vector<64x64xbf16>
    %cst_138 = arith.constant dense<0.000000e+00> : vector<13x64xf32>
    %157 = tpu.matmul %154, %156, %cst_138 {dimension_numbers = #tpu.dot_dimension_numbers<[1], [0], [0], [1], [0, 0, 1, 1], [], []>} : vector<13x64xbf16>, vector<64x64xbf16>, vector<13x64xf32> -> vector<13x64xf32>
    %158 = arith.addf %152, %157 : vector<13x64xf32>
    %c13_139 = arith.constant 13 : index
    %c0_140 = arith.constant 0 : index
    %159 = vector.load %arg14[%c13_139, %c0_140] : memref<37x64xf32, #tpu.memory_space<vmem>>, vector<13x64xf32>
    %160 = arith.truncf %159 : vector<13x64xf32> to vector<13x64xbf16>
    %c5_141 = arith.constant 5 : index
    %c0_142 = arith.constant 0 : index
    %c0_143 = arith.constant 0 : index
    %161 = vector.load %arg6[%c5_141, %c0_142, %c0_143] : memref<9x64x64xbf16, #tpu.memory_space<vmem>>, vector<1x64x64xbf16>
    %162 = vector.shape_cast %161 : vector<1x64x64xbf16> to vector<64x64xbf16>
    %cst_144 = arith.constant dense<0.000000e+00> : vector<13x64xf32>
    %163 = tpu.matmul %160, %162, %cst_144 {dimension_numbers = #tpu.dot_dimension_numbers<[1], [0], [0], [1], [0, 0, 1, 1], [], []>} : vector<13x64xbf16>, vector<64x64xbf16>, vector<13x64xf32> -> vector<13x64xf32>
    %164 = arith.addf %158, %163 : vector<13x64xf32>
    %c22_145 = arith.constant 22 : index
    %c0_146 = arith.constant 0 : index
    %165 = vector.load %arg14[%c22_145, %c0_146] : memref<37x64xf32, #tpu.memory_space<vmem>>, vector<13x64xf32>
    %166 = arith.truncf %165 : vector<13x64xf32> to vector<13x64xbf16>
    %c6_147 = arith.constant 6 : index
    %c0_148 = arith.constant 0 : index
    %c0_149 = arith.constant 0 : index
    %167 = vector.load %arg6[%c6_147, %c0_148, %c0_149] : memref<9x64x64xbf16, #tpu.memory_space<vmem>>, vector<1x64x64xbf16>
    %168 = vector.shape_cast %167 : vector<1x64x64xbf16> to vector<64x64xbf16>
    %cst_150 = arith.constant dense<0.000000e+00> : vector<13x64xf32>
    %169 = tpu.matmul %166, %168, %cst_150 {dimension_numbers = #tpu.dot_dimension_numbers<[1], [0], [0], [1], [0, 0, 1, 1], [], []>} : vector<13x64xbf16>, vector<64x64xbf16>, vector<13x64xf32> -> vector<13x64xf32>
    %170 = arith.addf %164, %169 : vector<13x64xf32>
    %c23_151 = arith.constant 23 : index
    %c0_152 = arith.constant 0 : index
    %171 = vector.load %arg14[%c23_151, %c0_152] : memref<37x64xf32, #tpu.memory_space<vmem>>, vector<13x64xf32>
    %172 = arith.truncf %171 : vector<13x64xf32> to vector<13x64xbf16>
    %c7_153 = arith.constant 7 : index
    %c0_154 = arith.constant 0 : index
    %c0_155 = arith.constant 0 : index
    %173 = vector.load %arg6[%c7_153, %c0_154, %c0_155] : memref<9x64x64xbf16, #tpu.memory_space<vmem>>, vector<1x64x64xbf16>
    %174 = vector.shape_cast %173 : vector<1x64x64xbf16> to vector<64x64xbf16>
    %cst_156 = arith.constant dense<0.000000e+00> : vector<13x64xf32>
    %175 = tpu.matmul %172, %174, %cst_156 {dimension_numbers = #tpu.dot_dimension_numbers<[1], [0], [0], [1], [0, 0, 1, 1], [], []>} : vector<13x64xbf16>, vector<64x64xbf16>, vector<13x64xf32> -> vector<13x64xf32>
    %176 = arith.addf %170, %175 : vector<13x64xf32>
    %c24_157 = arith.constant 24 : index
    %c0_158 = arith.constant 0 : index
    %177 = vector.load %arg14[%c24_157, %c0_158] : memref<37x64xf32, #tpu.memory_space<vmem>>, vector<13x64xf32>
    %178 = arith.truncf %177 : vector<13x64xf32> to vector<13x64xbf16>
    %c8_159 = arith.constant 8 : index
    %c0_160 = arith.constant 0 : index
    %c0_161 = arith.constant 0 : index
    %179 = vector.load %arg6[%c8_159, %c0_160, %c0_161] : memref<9x64x64xbf16, #tpu.memory_space<vmem>>, vector<1x64x64xbf16>
    %180 = vector.shape_cast %179 : vector<1x64x64xbf16> to vector<64x64xbf16>
    %cst_162 = arith.constant dense<0.000000e+00> : vector<13x64xf32>
    %181 = tpu.matmul %178, %180, %cst_162 {dimension_numbers = #tpu.dot_dimension_numbers<[1], [0], [0], [1], [0, 0, 1, 1], [], []>} : vector<13x64xbf16>, vector<64x64xbf16>, vector<13x64xf32> -> vector<13x64xf32>
    %182 = arith.addf %176, %181 : vector<13x64xf32>
    %c0_163 = arith.constant 0 : index
    %c0_164 = arith.constant 0 : index
    %183 = vector.load %arg7[%c0_163, %c0_164] : memref<1x64xf32, #tpu.memory_space<vmem>>, vector<1x64xf32>
    %184 = vector.broadcast %183 : vector<1x64xf32> to vector<13x64xf32>
    %185 = arith.addf %182, %184 : vector<13x64xf32>
    %cst_165 = arith.constant 0.000000e+00 : f32
    %186 = vector.broadcast %cst_165 : f32 to vector<13x64xf32>
    %187 = arith.maximumf %185, %186 : vector<13x64xf32>
    %188 = arith.truncf %187 : vector<13x64xf32> to vector<13x64xbf16>
    %189 = vector.extract_strided_slice %188 {offsets = [0, 0], sizes = [1, 64], strides = [1, 1]} : vector<13x64xbf16> to vector<1x64xbf16>
    %c0_166 = arith.constant 0 : index
    %c0_167 = arith.constant 0 : index
    %c0_168 = arith.constant 0 : index
    %190 = vector.load %arg8[%c0_166, %c0_167, %c0_168] : memref<4x64x512xbf16, #tpu.memory_space<vmem>>, vector<1x64x512xbf16>
    %191 = vector.shape_cast %190 : vector<1x64x512xbf16> to vector<64x512xbf16>
    %cst_169 = arith.constant dense<0.000000e+00> : vector<1x512xf32>
    %192 = tpu.matmul %189, %191, %cst_169 {dimension_numbers = #tpu.dot_dimension_numbers<[1], [0], [0], [1], [0, 0, 1, 1], [], []>} : vector<1x64xbf16>, vector<64x512xbf16>, vector<1x512xf32> -> vector<1x512xf32>
    %193 = vector.extract_strided_slice %188 {offsets = [1, 0], sizes = [1, 64], strides = [1, 1]} : vector<13x64xbf16> to vector<1x64xbf16>
    %c1_170 = arith.constant 1 : index
    %c0_171 = arith.constant 0 : index
    %c0_172 = arith.constant 0 : index
    %194 = vector.load %arg8[%c1_170, %c0_171, %c0_172] : memref<4x64x512xbf16, #tpu.memory_space<vmem>>, vector<1x64x512xbf16>
    %195 = vector.shape_cast %194 : vector<1x64x512xbf16> to vector<64x512xbf16>
    %cst_173 = arith.constant dense<0.000000e+00> : vector<1x512xf32>
    %196 = tpu.matmul %193, %195, %cst_173 {dimension_numbers = #tpu.dot_dimension_numbers<[1], [0], [0], [1], [0, 0, 1, 1], [], []>} : vector<1x64xbf16>, vector<64x512xbf16>, vector<1x512xf32> -> vector<1x512xf32>
    %197 = arith.addf %192, %196 : vector<1x512xf32>
    %198 = vector.extract_strided_slice %188 {offsets = [11, 0], sizes = [1, 64], strides = [1, 1]} : vector<13x64xbf16> to vector<1x64xbf16>
    %c2_174 = arith.constant 2 : index
    %c0_175 = arith.constant 0 : index
    %c0_176 = arith.constant 0 : index
    %199 = vector.load %arg8[%c2_174, %c0_175, %c0_176] : memref<4x64x512xbf16, #tpu.memory_space<vmem>>, vector<1x64x512xbf16>
    %200 = vector.shape_cast %199 : vector<1x64x512xbf16> to vector<64x512xbf16>
    %cst_177 = arith.constant dense<0.000000e+00> : vector<1x512xf32>
    %201 = tpu.matmul %198, %200, %cst_177 {dimension_numbers = #tpu.dot_dimension_numbers<[1], [0], [0], [1], [0, 0, 1, 1], [], []>} : vector<1x64xbf16>, vector<64x512xbf16>, vector<1x512xf32> -> vector<1x512xf32>
    %202 = arith.addf %197, %201 : vector<1x512xf32>
    %203 = vector.extract_strided_slice %188 {offsets = [12, 0], sizes = [1, 64], strides = [1, 1]} : vector<13x64xbf16> to vector<1x64xbf16>
    %c3_178 = arith.constant 3 : index
    %c0_179 = arith.constant 0 : index
    %c0_180 = arith.constant 0 : index
    %204 = vector.load %arg8[%c3_178, %c0_179, %c0_180] : memref<4x64x512xbf16, #tpu.memory_space<vmem>>, vector<1x64x512xbf16>
    %205 = vector.shape_cast %204 : vector<1x64x512xbf16> to vector<64x512xbf16>
    %cst_181 = arith.constant dense<0.000000e+00> : vector<1x512xf32>
    %206 = tpu.matmul %203, %205, %cst_181 {dimension_numbers = #tpu.dot_dimension_numbers<[1], [0], [0], [1], [0, 0, 1, 1], [], []>} : vector<1x64xbf16>, vector<64x512xbf16>, vector<1x512xf32> -> vector<1x512xf32>
    %207 = arith.addf %202, %206 : vector<1x512xf32>
    %c0_182 = arith.constant 0 : index
    %c0_183 = arith.constant 0 : index
    %208 = vector.load %arg9[%c0_182, %c0_183] : memref<1x512xf32, #tpu.memory_space<vmem>>, vector<1x512xf32>
    %209 = arith.addf %207, %208 : vector<1x512xf32>
    %cst_184 = arith.constant 0.000000e+00 : f32
    %210 = vector.broadcast %cst_184 : f32 to vector<1x512xf32>
    %211 = arith.maximumf %209, %210 : vector<1x512xf32>
    %212 = arith.truncf %211 : vector<1x512xf32> to vector<1x512xbf16>
    %c0_185 = arith.constant 0 : index
    %c0_186 = arith.constant 0 : index
    %213 = vector.load %arg10[%c0_185, %c0_186] : memref<512x128xbf16, #tpu.memory_space<vmem>>, vector<512x128xbf16>
    %cst_187 = arith.constant dense<0.000000e+00> : vector<1x128xf32>
    %214 = tpu.matmul %212, %213, %cst_187 {dimension_numbers = #tpu.dot_dimension_numbers<[1], [0], [0], [1], [0, 0, 1, 1], [], []>} : vector<1x512xbf16>, vector<512x128xbf16>, vector<1x128xf32> -> vector<1x128xf32>
    %c0_188 = arith.constant 0 : index
    %c0_189 = arith.constant 0 : index
    %215 = vector.load %arg11[%c0_188, %c0_189] : memref<1x128xf32, #tpu.memory_space<vmem>>, vector<1x128xf32>
    %216 = arith.addf %214, %215 : vector<1x128xf32>
    %cst_190 = arith.constant 0.000000e+00 : f32
    %217 = vector.broadcast %cst_190 : f32 to vector<1x128xf32>
    %218 = arith.maximumf %216, %217 : vector<1x128xf32>
    %219 = vector.shape_cast %218 : vector<1x128xf32> to vector<1x128xf32>
    %220 = vector.broadcast %219 : vector<1x128xf32> to vector<8x128xf32>
    %c0_191 = arith.constant 0 : index
    %c0_192 = arith.constant 0 : index
    %c0_193 = arith.constant 0 : index
    %221 = vector.load %arg12[%c0_191, %c0_192, %c0_193] : memref<1x8x128xf32, #tpu.memory_space<vmem>>, vector<1x8x128xf32>
    %222 = vector.shape_cast %221 : vector<1x8x128xf32> to vector<8x128xf32>
    %223 = vector.shape_cast %220 : vector<8x128xf32> to vector<1x8x128xf32>
    tpu.vector_store %arg12[%c0_191, %c0_192, %c0_193], %223 {strides = array<i32>} : memref<1x8x128xf32, #tpu.memory_space<vmem>>, vector<1x8x128xf32>,
    return
  }
  func.func @transform_0(%arg0: i32) -> (i32, i32, i32) {
    %c0_i32 = arith.constant 0 : i32
    %c0_i32_0 = arith.constant 0 : i32
    %c0_i32_1 = arith.constant 0 : i32
    return %arg0, %c0_i32, %c0_i32_0 : i32, i32, i32
  }
  func.func @transform_1(%arg0: i32) -> (i32, i32, i32) {
    %c0_i32 = arith.constant 0 : i32
    %c0_i32_0 = arith.constant 0 : i32
    %c0_i32_1 = arith.constant 0 : i32
    %c0_i32_2 = arith.constant 0 : i32
    return %c0_i32, %c0_i32_0, %c0_i32_1 : i32, i32, i32
  }
  func.func @transform_2(%arg0: i32) -> (i32, i32) {
    %c0_i32 = arith.constant 0 : i32
    %c0_i32_0 = arith.constant 0 : i32
    %c0_i32_1 = arith.constant 0 : i32
    return %c0_i32, %c0_i32_0 : i32, i32
  }
  func.func @transform_3(%arg0: i32) -> (i32, i32, i32) {
    %c0_i32 = arith.constant 0 : i32
    %c0_i32_0 = arith.constant 0 : i32
    %c0_i32_1 = arith.constant 0 : i32
    %c0_i32_2 = arith.constant 0 : i32
    return %c0_i32, %c0_i32_0, %c0_i32_1 : i32, i32, i32
  }
  func.func @transform_4(%arg0: i32) -> (i32, i32) {
    %c0_i32 = arith.constant 0 : i32
    %c0_i32_0 = arith.constant 0 : i32
    %c0_i32_1 = arith.constant 0 : i32
    return %c0_i32, %c0_i32_0 : i32, i32
  }
  func.func @transform_5(%arg0: i32) -> (i32, i32, i32) {
    %c0_i32 = arith.constant 0 : i32
    %c0_i32_0 = arith.constant 0 : i32
    %c0_i32_1 = arith.constant 0 : i32
    %c0_i32_2 = arith.constant 0 : i32
    return %c0_i32, %c0_i32_0, %c0_i32_1 : i32, i32, i32
  }
  func.func @transform_6(%arg0: i32) -> (i32, i32) {
    %c0_i32 = arith.constant 0 : i32
    %c0_i32_0 = arith.constant 0 : i32
    %c0_i32_1 = arith.constant 0 : i32
    return %c0_i32, %c0_i32_0 : i32, i32
  }
  func.func @transform_7(%arg0: i32) -> (i32, i32, i32) {
    %c0_i32 = arith.constant 0 : i32
    %c0_i32_0 = arith.constant 0 : i32
    %c0_i32_1 = arith.constant 0 : i32
    %c0_i32_2 = arith.constant 0 : i32
    return %c0_i32, %c0_i32_0, %c0_i32_1 : i32, i32, i32
  }
  func.func @transform_8(%arg0: i32) -> (i32, i32) {
    %c0_i32 = arith.constant 0 : i32
    %c0_i32_0 = arith.constant 0 : i32
    %c0_i32_1 = arith.constant 0 : i32
    return %c0_i32, %c0_i32_0 : i32, i32
  }
  func.func @transform_9(%arg0: i32) -> (i32, i32) {
    %c0_i32 = arith.constant 0 : i32
    %c0_i32_0 = arith.constant 0 : i32
    %c0_i32_1 = arith.constant 0 : i32
    return %c0_i32, %c0_i32_0 : i32, i32
  }
  func.func @transform_10(%arg0: i32) -> (i32, i32) {
    %c0_i32 = arith.constant 0 : i32
    %c0_i32_0 = arith.constant 0 : i32
    %c0_i32_1 = arith.constant 0 : i32
    return %c0_i32, %c0_i32_0 : i32, i32
  }
  func.func @transform_11(%arg0: i32) -> (i32, i32, i32) {
    %c0_i32 = arith.constant 0 : i32
    %c0_i32_0 = arith.constant 0 : i32
    %c0_i32_1 = arith.constant 0 : i32
    return %arg0, %c0_i32, %c0_i32_0 : i32, i32, i32
  }
}

</mosaic_0001>

<bundles_post_ra>
// kernel: forward.1
= control target key start
LH: loop header
LB: loop body
LE: loop exit
PB: predicated region body
PF: predicated region fallthrough
CT: control target
= control target key end

     0   :  { %s5112_s17 = smov 0   ;;  %s6196_s0 = inlined_call_operand.vmem [shape: bf16[2,121,64], index: 0, kind: input, shape index: {}]   ;;  %s6197_s1 = inlined_call_operand.vmem [shape: bf16[4,64,32], index: 1, kind: input, shape index: {}]   ;;  %s6198_s2 = inlined_call_operand.vmem [shape: f32[1,32], index: 2, kind: input, shape index: {}]   ;;  %s6199_s3 = inlined_call_operand.vmem [shape: bf16[16,32,64], index: 3, kind: input, shape index: {}]   ;;  %s6200_s4 = inlined_call_operand.vmem [shape: f32[1,64], index: 4, kind: input, shape index: {}]   ;;  %s6201_s5 = inlined_call_operand.vmem [shape: bf16[9,64,64], index: 5, kind: input, shape index: {}]   ;;  %s6202_s6 = inlined_call_operand.vmem [shape: f32[1,64], index: 6, kind: input, shape index: {}]   ;;  %s6203_s7 = inlined_call_operand.vmem [shape: bf16[4,64,512], index: 7, kind: input, shape index: {}]   ;;  %s6204_s8 = inlined_call_operand.vmem [shape: f32[1,512], index: 8, kind: input, shape index: {}]   ;;  %s6205_s9 = inlined_call_operand.vmem [shape: bf16[512,128], index: 9, kind: input, shape index: {}]   ;;  %s6206_s10 = inlined_call_operand.vmem [shape: f32[1,128], index: 10, kind: input, shape index: {}]   ;;  %s6207_s11 = inlined_call_operand.vmem [shape: f32[2,8,128], index: 11, kind: output, shape index: {}]  }
   0x1 LB: > { %s3720_s18 = sadd.s32 4294967295, %s5050_s17   ;;  %p3724_p0 = scmp.ge.s32.totalorder %s5050_s17, 1  ;;  %s5050_s17 = sphi %s5112_s17, %s21_s17  }
   0x2   : > { %p337_p1 = scmp.lt.s32.totalorder %s5050_s17, 3 }
   0x4   : > { %p338_p2 = pnand %p3724_p0, %p337_p1 }
   0x5   : > { %p376_p3 = scmp.lt.s32.totalorder (!%p338_p2), %s3720_s18, 1 }
   0x6   : > { %341 = sbr.rel (%p338_p2) target bundleno = 1034 (0x40a), region = 64 }
   0xb   : > { %v4846_v0 = vld [vmem:[%s6197_s1 + $0x38] sm:$0xff]  ;;  %v4845_v4 = vld [vmem:[%s6197_s1 + $0x30] sm:$0xff]  ;;  %s6209_s18 = smov (!%p376_p3, %s3720_s18), 1  ;;  %v4844_v8 = vld [vmem:[%s6197_s1 + $0x28] sm:$0xff]  ;;  %vm452_vm0 = vsmask.f32 7424 }
   0xc   : > { %v4842_v1 = vld [vmem:[%s6197_s1 + $0x18] sm:$0xff]  ;;  %558 = vmatpush.bf16.msra.mxu0 %v4846_v0  ;;  %v4841_v5 = vld [vmem:[%s6197_s1 + $0x10] sm:$0xff]  ;;  %v4840_v9 = vld [vmem:[%s6197_s1 + $0x8] sm:$0xff]  ;;  %s4831_s22 = sshll.u32 %s6209_s18, 6  ;;  %vm966_vm1 = vcmask 1045504   ;;  %vm532_vm3 = vcmask 523264  }
   0xd   : > { %v4857_v2 = vld [vmem:[%s6197_s1 + $0x58] sm:$0xff]  ;;  %640 = vmatpush.bf16.msra.mxu1 %v4842_v1  ;;  %v4856_v6 = vld [vmem:[%s6197_s1 + $0x50] sm:$0xff]  ;;  %v4855_v10 = vld [vmem:[%s6197_s1 + $0x48] sm:$0xff]  ;;  %s5162_s29 = scalar_lea.vmem %s6196_s0, %s4831_s22  ;;  %vm738_vm2 = vsmask.f32 6400  ;;  %vm1117_vm4 = vcmask 261120  }
   0xe   : > { %v4868_v3 = vld [vmem:[%s6197_s1 + $0x78] sm:$0xff]  ;;  %850 = vmatpush.bf16.msra.mxu2 %v4857_v2  ;;  %v4867_v7 = vld [vmem:[%s6197_s1 + $0x70] sm:$0xff]  ;;  %v4866_v11 = vld [vmem:[%s6197_s1 + $0x68] sm:$0xff]  ;;  %vm1131_vm5 = vcmask 258048   ;;  %vm2202_vm6 = vcmask 520192   ;;  %s3727_s28 = sshll.u32 %s6209_s18, 3 }
   0xf   : > { %1031 = vmatpush.bf16.msra.mxu3 %v4868_v3  ;;  %v4832_v12 = vld [vmem:[%s5162_s29] sm:$0xff]  ;;  %v5166_v13 = vld [vmem:[%s5162_s29 + $0x8] sm:$0xff]  ;;  %v4849_v46 = vld [vmem:[%s5162_s29 + $0x14] sm:$0xff]  ;;  %s384_s12 = scalar_lea.vmem %s6207_s11, %s3727_s28 }
  0x10   : > { %559 = vmatpush.bf16.msra.mxu0 %v4845_v4  ;;  %v3820_v14 = vld [vmem:[%s5162_s29 + $0x4] sm:$0xe]  ;;  %v4847_v15 = vld [vmem:[%s5162_s29 + $0x4] sm:$0xf0]  ;;  %v4848_v16 = vld [vmem:[%s5162_s29 + $0xc] sm:$0xff]  ;;  %v454_v18 = vshrl.u32 %v4832_v12, 16 }
  0x11   : > { %641 = vmatpush.bf16.msra.mxu1 %v4841_v5  ;;  %v3879_v17 = vld [vmem:[%s5162_s29 + $0x4] sm:$0xc]  ;;  %v456_v19 = vshll.u32 %v4832_v12, 16  ;;  %v461_v20 = vshll.u32 %v5166_v13, 16  ;;  %v3821_v21 = vor.u32 %v4847_v15, %v3820_v14  ;;  %v4858_v22 = vld [vmem:[%s5162_s29 + $0x4] sm:$0xf0] }
  0x12   : > { %851 = vmatpush.bf16.msra.mxu2 %v4856_v6  ;;  %v4859_v23 = vld [vmem:[%s5162_s29 + $0xc] sm:$0xff]  ;;  %v4843_v24 = vld [vmem:[%s6197_s1 + $0x20] sm:$0xff]  ;;  %v748_v26 = vshrl.u32 %v4848_v16, 16  ;;  %v751_v27 = vshll.u32 %v4848_v16, 16  ;;  %v3880_v28 = vor.u32 %v4858_v22, %v3879_v17  ;;  %v757_v49 = vshrl.u32 %v4849_v46, 16  ;;  %v4860_v55 = vld [vmem:[%s5162_s29 + $0x14] sm:$0xff] }
  0x13   : > { %1032 = vmatpush.bf16.msra.mxu3 %v4867_v7  ;;  %v4839_v25 = vld [vmem:[%s6197_s1] sm:$0xff]  ;;  %v458_v31 = vrot.slane %v456_v19, 1  ;;  %v463_v32 = vrot.slane %v461_v20, 1  ;;  %v740_v33 = vshrl.u32 %v3821_v21, 16  ;;  %v743_v34 = vshll.u32 %v3821_v21, 16  ;;  %v4834_v48 = vld [vmem:[%s5162_s29 + $0x10] sm:$0xff] }
  0x14   : > { %560 = vmatpush.bf16.msra.mxu0 %v4844_v8  ;;  %v4854_v29 = vld [vmem:[%s6197_s1 + $0x40] sm:$0xff]  ;;  %v750_v35 = vrot.slane %v748_v26, 1  ;;  %v753_v36 = vrot.slane %v751_v27, 2  ;;  %v967_v37 = vrot.slane %v3880_v28, 2  ;;  %v968_v38 = vrot.slane %v4859_v23, 2  ;;  %v4835_v0 = vld [vmem:[%s5162_s29 + $0x18] sm:$0xff] }
  0x15   : > { %642 = vmatpush.bf16.msra.mxu1 %v4840_v9  ;;  %v4865_v30 = vld [vmem:[%s6197_s1 + $0x60] sm:$0xff]  ;;  %v459_v39 = vor.u32 %v458_v31, %v454_v18  ;;  %v742_v40 = vrot.slane %v740_v33, 1  ;;  %v745_v41 = vrot.slane %v743_v34, 2  ;;  %v760_v50 = vshll.u32 %v4849_v46, 16  ;;  %v4852_v31 = vld [vmem:[%s5162_s29 + $0x2c] sm:$0xff]  ;;  %v4872_v34 = vld [vmem:[%s6199_s3 + $0x18] sm:$0xff] }
  0x16   : > { %852 = vmatpush.bf16.msra.mxu2 %v4855_v10  ;;  %v754_v42 = vor.u32 %v753_v36, %v750_v35  ;;  %v969_v45 = vsel %vm966_vm1, %v967_v37, %v968_v38  ;;  %v465_v51 = vshrl.u32 %v5166_v13, 16  ;;  %v469_v52 = vshll.u32 %v4834_v48, 16  ;;  %v4850_v63 = vld [vmem:[%s5162_s29 + $0x1c] sm:$0xff]  ;;  %v4851_v15 = vld [vmem:[%s5162_s29 + $0x24] sm:$0xff] }
  0x17   : > { %1033 = vmatpush.bf16.msra.mxu3 %v4866_v11  ;;  %v464_v43 = vsel %vm452_vm0, %v459_v39, %v463_v32  ;;  %v746_v44 = vor.u32 %v745_v41, %v742_v40  ;;  %v759_v53 = vrot.slane %v757_v49, 1  ;;  %v762_v54 = vrot.slane %v760_v50, 2  ;;  %v4861_v7 = vld [vmem:[%s5162_s29 + $0x1c] sm:$0xff]  ;;  %v4862_v23 = vld [vmem:[%s5162_s29 + $0x24] sm:$0xff] }
  0x18   : > { %561 = vmatpush.bf16.msra.mxu0 %v4843_v24  ;;  %v467_v56 = vor.u32 %v465_v51, %v463_v32  ;;  %v471_v57 = vrot.slane %v469_v52, 1  ;;  %v970_v59 = vrot.slane %v4860_v55, 2  ;;  %v766_v1 = vshrl.u32 %v4850_v63, 16  ;;  %v4836_v16 = vld [vmem:[%s5162_s29 + $0x20] sm:$0xff]  ;;  %v4837_v32 = vld [vmem:[%s5162_s29 + $0x28] sm:$0xff]  ;;  %v4876_v35 = vld [vmem:[%s6199_s3 + $0x38] sm:$0xff] }
  0x19   : > { %643 = vmatpush.bf16.msra.mxu1 %v4839_v25  ;;  %v755_v47 = vsel %vm738_vm2, %v746_v44, %v754_v42  ;;  %v763_v58 = vor.u32 %v762_v54, %v759_v53  ;;  %v769_v2 = vshll.u32 %v4850_v63, 16  ;;  %v473_v3 = vshrl.u32 %v4834_v48, 16  ;;  %v4874_v33 = vld [vmem:[%s6199_s3 + $0x28] sm:$0xff]  ;;  %v4853_v51 = vld [vmem:[%s5162_s29 + $0x34] sm:$0xff]  ;;  %v3762_v52 = vld [vmem:[%s5162_s29 + $0x30] sm:$0xf] }
  0x1a   : > { %853 = vmatpush.bf16.msra.mxu2 %v4854_v29  ;;  %v472_v60 = vsel %vm452_vm0, %v467_v56, %v471_v57  ;;  %v971_v62 = vsel %vm966_vm1, %v968_v38, %v970_v59  ;;  %v477_v4 = vshll.u32 %v4835_v0, 16  ;;  %v768_v5 = vrot.slane %v766_v1, 1  ;;  %v4870_v38 = vld [vmem:[%s6199_s3 + $0x8] sm:$0xff]  ;;  %v4838_v53 = vld [vmem:[%s5162_s29 + $0x30] sm:$0x70] }
  0x1b   : > { %1034 = vmatpush.bf16.msra.mxu3 %v4865_v30  ;;  %3780 = vmatmul.msk.bf16.vlgmr.msra.gmra.mxu0 %vm532_vm3, %v464_v43  ;;  %v764_v61 = vsel %vm738_vm2, %v754_v42, %v763_v58  ;;  %v771_v6 = vrot.slane %v769_v2, 2  ;;  %v475_v8 = vor.u32 %v473_v3, %v471_v57  ;;  %v972_v11 = vrot.slane %v4861_v7, 2  ;;  %v4863_v43 = vld [vmem:[%s5162_s29 + $0x2c] sm:$0xff] }
  0x1c   : > { %3803 = vmatmul.msk.bf16.vlgmr.msra.gmra.mxu1 %vm532_vm3, %v4832_v12  ;;  %v479_v9 = vrot.slane %v477_v4, 1  ;;  %v775_v17 = vshrl.u32 %v4851_v15, 16  ;;  %v778_v18 = vshll.u32 %v4851_v15, 16  ;;  %v481_v19 = vshrl.u32 %v4835_v0, 16  ;;  %1194 = vmatpush.bf16.msrb.mxu0 %v4872_v34  ;;  %v4869_v15 = vld [vmem:[%s6199_s3] sm:$0xff] }
  0x1d   : > { %3862 = vmatmul.msk.bf16.vlgmr.msra.gmra.mxu2 %vm532_vm3, %v755_v47  ;;  %v772_v10 = vor.u32 %v771_v6, %v768_v5  ;;  %v973_v14 = vsel %vm966_vm1, %v970_v59, %v972_v11  ;;  %v485_v20 = vshll.u32 %v4836_v16, 16  ;;  %v974_v27 = vrot.slane %v4862_v23, 2  ;;  %1238 = vmatpush.bf16.msrb.mxu1 %v4870_v38  ;;  %v918_v5 = vld [vmem:[%s5162_s29 + $0x3c] sm:$0x1] }
  0x1e   : > { %3921 = vmatmul.msk.bf16.vlgmr.msra.gmra.mxu3 %vm532_vm3, %v969_v45  ;;  %v480_v12 = vsel %vm452_vm0, %v475_v8, %v479_v9  ;;  %v777_v21 = vrot.slane %v775_v17, 1  ;;  %v780_v22 = vrot.slane %v778_v18, 2  ;;  %v483_v24 = vor.u32 %v481_v19, %v479_v9  ;;  %1300 = vmatpush.bf16.msrb.mxu2 %v4874_v33 }
  0x1f   : > { %v487_v25 = vrot.slane %v485_v20, 1  ;;  %v975_v30 = vsel %vm966_vm1, %v972_v11, %v974_v27  ;;  %v784_v36 = vshrl.u32 %v4852_v31, 16  ;;  %v787_v37 = vshll.u32 %v4852_v31, 16  ;;  %1367 = vmatpush.bf16.msrb.mxu3 %v4876_v35 }
  0x20   : > { %v781_v26 = vor.u32 %v780_v22, %v777_v21  ;;  %v489_v39 = vshrl.u32 %v4836_v16, 16  ;;  %v493_v40 = vshll.u32 %v4837_v32, 16  ;;  %v976_v47 = vrot.slane %v4863_v43, 2  ;;  %v5280_v22 = vld [vmem:[%s6198_s2] ss:$0 sm:$0xff] }
  0x21   : > { %v488_v28 = vsel %vm452_vm0, %v483_v24, %v487_v25  ;;  %v786_v41 = vrot.slane %v784_v36, 1  ;;  %v789_v42 = vrot.slane %v787_v37, 2  ;;  %v3763_v54 = vor.u32 %v4838_v53, %v3762_v52  ;;  %1239 = vmatpush.bf16.msrb.mxu1 %v4869_v15  ;;  %v4880_v15 = vld [vmem:[%s6199_s3 + $0x58] sm:$0xff] }
  0x22   : > { %v782_v29 = vsel %vm738_vm2, %v772_v10, %v781_v26  ;;  %v491_v44 = vor.u32 %v489_v39, %v487_v25  ;;  %v495_v45 = vrot.slane %v493_v40, 1  ;;  %v977_v50 = vsel %vm966_vm1, %v974_v27, %v976_v47 }
  0x23   : > { %v790_v46 = vor.u32 %v789_v42, %v786_v41  ;;  %v793_v55 = vshrl.u32 %v4853_v51, 16  ;;  %v796_v56 = vshll.u32 %v4853_v51, 16  ;;  %v497_v57 = vshrl.u32 %v4837_v32, 16 }
  0x24   : > { %v957_v6 = vunpack.c.l.b16 %v918_v5  ;;  %v505_v8 = vshrl.u32 %v3763_v54, 16 }
  0x25   : > { %v791_v49 = vsel %vm738_vm2, %v781_v26, %v790_v46  ;;  %v795_v59 = vrot.slane %v793_v55, 1  ;;  %1501 = vmatpush.bf16.msra.mxu1 %v4880_v15 }
  0x26   : > { %v965_v7 = vpack.c.b16 %v957_v6, %v957_v6 }
  0x28   : > { %v980_v9 = vrot.slane %v965_v7, 2 }
  0x2b   : > { %3781 = vmatmul.msk.bf16.gmra.mxu0 %vm532_vm3, %v472_v60  ;;  %v798_v60 = vrot.slane %v796_v56, 2 }
  0x2c   : > { %3804 = vmatmul.msk.bf16.gmra.mxu1 %vm532_vm3, %v5166_v13  ;;  %v773_v13 = vsel %vm738_vm2, %v763_v58, %v772_v10  ;;  %v501_v58 = vshll.u32 %v3763_v54, 16 }
  0x2d   : > { %3863 = vmatmul.msk.bf16.gmra.mxu2 %vm532_vm3, %v764_v61  ;;  %v4864_v61 = vld [vmem:[%s5162_s29 + $0x34] sm:$0xff] }
  0x2e   : > { %3922 = vmatmul.msk.bf16.gmra.mxu3 %vm532_vm3, %v971_v62  ;;  %v499_v62 = vor.u32 %v497_v57, %v495_v45  ;;  %v503_v63 = vrot.slane %v501_v58, 1  ;;  %v978_v1 = vrot.slane %v4864_v61, 2 }
  0x30   : > { %v504_v2 = vsel %vm452_vm0, %v499_v62, %v503_v63  ;;  %v979_v4 = vsel %vm966_vm1, %v976_v47, %v978_v1  ;;  %v507_v10 = vor.u32 %v505_v8, %v503_v63  ;;  %v981_v11 = vsel %vm966_vm1, %v978_v1, %v980_v9 }
  0x3b   : > { %3782 = vmatmul.msk.bf16.gmra.mxu0 %vm532_vm3, %v480_v12  ;;  %v4873_v12 = vld [vmem:[%s6199_s3 + $0x20] sm:$0xff] }
  0x3c   : > { %3805 = vmatmul.msk.bf16.gmra.mxu1 %vm532_vm3, %v4834_v48  ;;  %v496_v48 = vsel %vm452_vm0, %v491_v44, %v495_v45  ;;  %1301 = vmatpush.bf16.msrb.mxu2 %v4873_v12  ;;  %v4882_v12 = vld [vmem:[%s6199_s3 + $0x68] sm:$0xff] }
  0x3d   : > { %3864 = vmatmul.msk.bf16.gmra.mxu2 %vm532_vm3, %v773_v13  ;;  %v4871_v13 = vld [vmem:[%s6199_s3 + $0x10] sm:$0xff] }
  0x3e   : > { %3923 = vmatmul.msk.bf16.gmra.mxu3 %vm532_vm3, %v973_v14  ;;  %v4875_v14 = vld [vmem:[%s6199_s3 + $0x30] sm:$0xff]  ;;  %1195 = vmatpush.bf16.msrb.mxu0 %v4871_v13  ;;  %v4878_v13 = vld [vmem:[%s6199_s3 + $0x48] sm:$0xff] }
  0x3f   : > { %1368 = vmatpush.bf16.msrb.mxu3 %v4875_v14  ;;  %v4884_v14 = vld [vmem:[%s6199_s3 + $0x78] sm:$0xff] }
  0x40   : > { %1568 = vmatpush.bf16.msra.mxu2 %v4882_v12 }
  0x42   : > { %1434 = vmatpush.bf16.msra.mxu0 %v4878_v13 }
  0x43   : > { %1635 = vmatpush.bf16.msra.mxu3 %v4884_v14 }
  0x4b   : > { %3783 = vmatmul.msk.bf16.gmra.mxu0 %vm532_vm3, %v488_v28 }
  0x4c   : > { %3806 = vmatmul.msk.bf16.gmra.mxu1 %vm532_vm3, %v4835_v0  ;;  %v799_v0 = vor.u32 %v798_v60, %v795_v59 }
  0x4d   : > { %3865 = vmatmul.msk.bf16.gmra.mxu2 %vm532_vm3, %v782_v29 }
  0x4e   : > { %3924 = vmatmul.msk.bf16.gmra.mxu3 %vm532_vm3, %v975_v30  ;;  %v800_v3 = vsel %vm738_vm2, %v790_v46, %v799_v0 }
  0x5b   : > { %3784 = vmatmul.msk.bf16.gmra.mxu0 %vm532_vm3, %v496_v48 }
  0x5c   : > { %3807 = vmatmul.msk.bf16.gmra.mxu1 %vm532_vm3, %v4836_v16 }
  0x5d   : > { %3866 = vmatmul.msk.bf16.gmra.mxu2 %vm532_vm3, %v791_v49 }
  0x5e   : > { %3925 = vmatmul.msk.bf16.gmra.mxu3 %vm532_vm3, %v977_v50 }
  0x6b   : > { %3785 = vmatmul.msk.bf16.gmra.mxu0 %vm532_vm3, %v504_v2 }
  0x6c   : > { %3808 = vmatmul.msk.bf16.gmra.mxu1 %vm532_vm3, %v4837_v32 }
  0x6d   : > { %3867 = vmatmul.msk.bf16.gmra.mxu2 %vm532_vm3, %v800_v3 }
  0x6e   : > { %3926 = vmatmul.msk.bf16.gmra.mxu3 %vm532_vm3, %v979_v4 }
  0x7b   : > { %3786 = vmatmul.msk.bf16.gmra.mxu0 %vm532_vm3, %v507_v10 }
  0x7c   : > { %3809 = vmatmul.msk.bf16.gmra.mxu1 %vm532_vm3, %v3763_v54 }
  0x7d   : > { %3868 = vmatmul.msk.bf16.gmra.mxu2 %vm532_vm3, %v799_v0 }
  0x7e   : > { %3927 = vmatmul.msk.bf16.gmra.mxu3 %vm532_vm3, %v981_v11 }
  0x98   : > { %v563_v16 = vpop.f32.mrf.mxu0 }
  0x99   : > { %v645_v17 = vpop.f32.mrf.mxu1 }
  0x9a   : > { %v646_v18 = vadd.f32 %v645_v17, %v563_v16 }
  0xa0   : > { %v855_v19 = vpop.f32.mrf.mxu2  ;;  %v565_v23 = vpop.f32.mrf.mxu0 }
  0xa1   : > { %v1036_v20 = vpop.f32.mrf.mxu3  ;;  %v890_v21 = vadd.f32 %v855_v19, %v646_v18  ;;  %v647_v24 = vpop.f32.mrf.mxu1 }
  0xa2   : > { %v648_v28 = vadd.f32 %v647_v24, %v565_v23 }
  0xa3   : > { %v1071_v25 = vadd.f32 %v1036_v20, %v890_v21 }
  0xa5   : > { %v1089_v26 = vadd.f32 %v5280_v22, %v1071_v25 }
  0xa7   : > { %v1103_v27 = vmax.f32 %v1089_v26, 0.0 }
  0xa8   : > { %v857_v29 = vpop.f32.mrf.mxu2  ;;  %v568_v32 = vpop.f32.mrf.mxu0 }
  0xa9   : > { %v1038_v30 = vpop.f32.mrf.mxu3  ;;  %1118 = vst.msk [vmem:[#allocation2] sm:$0xff] %vm1117_vm4, %v1103_v27  ;;  %v891_v31 = vadd.f32 %v857_v29, %v648_v28  ;;  %v650_v33 = vpop.f32.mrf.mxu1 }
  0xaa   : > { %v651_v36 = vadd.f32 %v650_v33, %v568_v32 }
  0xab   : > { %v1072_v34 = vadd.f32 %v1038_v30, %v891_v31 }
  0xad   : > { %v1090_v35 = vadd.f32 %v5280_v22, %v1072_v34 }
  0xaf   : > { %v1104_v37 = vmax.f32 %v1090_v35, 0.0 }
  0xb0   : > { %v860_v38 = vpop.f32.mrf.mxu2  ;;  %v570_v41 = vpop.f32.mrf.mxu0 }
  0xb1   : > { %v1041_v39 = vpop.f32.mrf.mxu3  ;;  %1119 = vst.msk [vmem:[#allocation2 + $0x8] sm:$0xff] %vm1117_vm4, %v1104_v37  ;;  %v892_v40 = vadd.f32 %v860_v38, %v651_v36  ;;  %v652_v42 = vpop.f32.mrf.mxu1 }
  0xb2   : > { %v653_v46 = vadd.f32 %v652_v42, %v570_v41 }
  0xb3   : > { %v1073_v43 = vadd.f32 %v1041_v39, %v892_v40 }
  0xb5   : > { %v1091_v44 = vadd.f32 %v5280_v22, %v1073_v43 }
  0xb7   : > { %v1105_v45 = vmax.f32 %v1091_v44, 0.0 }
  0xb8   : > { %v862_v47 = vpop.f32.mrf.mxu2  ;;  %v573_v50 = vpop.f32.mrf.mxu0  ;;  %v1150_v1 = vld [vmem:[#allocation2 + $0x1] ss:$2 sm:$0xff]  ;;  %v1133_v5 = vld [vmem:[#allocation2] ss:$2 sm:$0xff] }
  0xb9   : > { %v1043_v48 = vpop.f32.mrf.mxu3  ;;  %1120 = vst.msk [vmem:[#allocation2 + $0x10] sm:$0xff] %vm1117_vm4, %v1105_v45  ;;  %v893_v49 = vadd.f32 %v862_v47, %v653_v46  ;;  %v655_v51 = vpop.f32.mrf.mxu1 }
  0xba   : > { %v656_v54 = vadd.f32 %v655_v51, %v573_v50  ;;  %v4881_v50 = vld [vmem:[%s6199_s3 + $0x60] sm:$0xff] }
  0xbb   : > { %v1074_v52 = vadd.f32 %v1043_v48, %v893_v49  ;;  %v4877_v51 = vld [vmem:[%s6199_s3 + $0x40] sm:$0xff]  ;;  %1569 = vmatpush.bf16.msra.mxu2 %v4881_v50 }
  0xbc   : > { %1435 = vmatpush.bf16.msra.mxu0 %v4877_v51 }
  0xbd   : > { %v1092_v53 = vadd.f32 %v5280_v22, %v1074_v52  ;;  %v4883_v52 = vld [vmem:[%s6199_s3 + $0x70] sm:$0xff] }
  0xbe   : > { %1636 = vmatpush.bf16.msra.mxu3 %v4883_v52 }
  0xbf   : > { %v1106_v55 = vmax.f32 %v1092_v53, 0.0  ;;  %v4879_v53 = vld [vmem:[%s6199_s3 + $0x50] sm:$0xff] }
  0xc0   : > { %v865_v56 = vpop.f32.mrf.mxu2  ;;  %v575_v59 = vpop.f32.mrf.mxu0  ;;  %v1256_v20 = vld [vmem:[#allocation2 + $0x2] ss:$2 sm:$0xff]  ;;  %v1323_v25 = vld [vmem:[#allocation2 + $0x3] ss:$2 sm:$0xff]  ;;  %1502 = vmatpush.bf16.msra.mxu1 %v4879_v53 }
  0xc1   : > { %v1046_v57 = vpop.f32.mrf.mxu3  ;;  %1121 = vst.msk [vmem:[#allocation2 + $0x18] sm:$0xff] %vm1117_vm4, %v1106_v55  ;;  %v894_v58 = vadd.f32 %v865_v56, %v656_v54  ;;  %v657_v60 = vpop.f32.mrf.mxu1 }
  0xc2   : > { %v658_v0 = vadd.f32 %v657_v60, %v575_v59 }
  0xc3   : > { %v1075_v61 = vadd.f32 %v1046_v57, %v894_v58 }
  0xc5   : > { %v1093_v62 = vadd.f32 %v5280_v22, %v1075_v61 }
  0xc7   : > { %v1107_v63 = vmax.f32 %v1093_v62, 0.0 }
  0xc8   : > { %v867_v2 = vpop.f32.mrf.mxu2  ;;  %v1152_v4 = vld [vmem:[#allocation2 + $0x11] ss:$2 sm:$0xff]  ;;  %v1135_v6 = vld [vmem:[#allocation2 + $0x10] ss:$2 sm:$0xff]  ;;  %v578_v8 = vpop.f32.mrf.mxu0 }
  0xc9   : > { %v1048_v3 = vpop.f32.mrf.mxu3  ;;  %1122 = vst.msk [vmem:[#allocation2 + $0x20] sm:$0xff] %vm1117_vm4, %v1107_v63  ;;  %v895_v7 = vadd.f32 %v867_v2, %v658_v0  ;;  %v660_v9 = vpop.f32.mrf.mxu1  ;;  %v1159_v10 = vpack.c.bf16 %v1152_v4, %v1150_v1  ;;  %v1142_v11 = vpack.c.bf16 %v1135_v6, %v1133_v5 }
  0xca   : > { %v661_v18 = vadd.f32 %v660_v9, %v578_v8 }
  0xcb   : > { %v1076_v16 = vadd.f32 %v1048_v3, %v895_v7  ;;  %3940 = vmatmul.msk.bf16.vlgmr.msrb.gmra.mxu0 %vm1117_vm4, %v1159_v10  ;;  %3951 = vmatmul.msk.bf16.vlgmr.msrb.gmra.mxu1 %vm1117_vm4, %v1142_v11 }
  0xcd   : > { %v1094_v17 = vadd.f32 %v5280_v22, %v1076_v16 }
  0xcf   : > { %v1108_v19 = vmax.f32 %v1094_v17, 0.0 }
  0xd0   : > { %v870_v21 = vpop.f32.mrf.mxu2  ;;  %v1258_v24 = vld [vmem:[#allocation2 + $0x12] ss:$2 sm:$0xff]  ;;  %v1325_v26 = vld [vmem:[#allocation2 + $0x13] ss:$2 sm:$0xff]  ;;  %v580_v28 = vpop.f32.mrf.mxu0 }
  0xd1   : > { %v1051_v23 = vpop.f32.mrf.mxu3  ;;  %1123 = vst.msk [vmem:[#allocation2 + $0x28] sm:$0xff] %vm1117_vm4, %v1108_v19  ;;  %v896_v27 = vadd.f32 %v870_v21, %v661_v18  ;;  %v662_v29 = vpop.f32.mrf.mxu1  ;;  %v1265_v30 = vpack.c.bf16 %v1258_v24, %v1256_v20  ;;  %v1332_v31 = vpack.c.bf16 %v1325_v26, %v1323_v25  ;;  %v4890_v21 = vld [vmem:[%s6199_s3 + $0xa8] sm:$0xff]  ;;  %v4892_v24 = vld [vmem:[%s6199_s3 + $0xb8] sm:$0xff] }
  0xd2   : > { %v663_v35 = vadd.f32 %v662_v29, %v580_v28  ;;  %v4888_v25 = vld [vmem:[%s6199_s3 + $0x98] sm:$0xff] }
  0xd3   : > { %v1077_v32 = vadd.f32 %v1051_v23, %v896_v27  ;;  %3966 = vmatmul.msk.bf16.vlgmr.msrb.gmra.mxu2 %vm1117_vm4, %v1265_v30  ;;  %3981 = vmatmul.msk.bf16.vlgmr.msrb.gmra.mxu3 %vm1117_vm4, %v1332_v31  ;;  %v4886_v23 = vld [vmem:[%s6199_s3 + $0x88] sm:$0xff] }
  0xd4   : > { %1836 = vmatpush.bf16.msrb.mxu2 %v4890_v21  ;;  %1702 = vmatpush.bf16.msrb.mxu0 %v4886_v23 }
  0xd5   : > { %v1095_v33 = vadd.f32 %v5280_v22, %v1077_v32  ;;  %1903 = vmatpush.bf16.msrb.mxu3 %v4892_v24  ;;  %1769 = vmatpush.bf16.msrb.mxu1 %v4888_v25 }
  0xd7   : > { %v1109_v34 = vmax.f32 %v1095_v33, 0.0 }
  0xd8   : > { %v872_v36 = vpop.f32.mrf.mxu2  ;;  %v583_v39 = vpop.f32.mrf.mxu0  ;;  %v1154_v58 = vld [vmem:[#allocation2 + $0x21] ss:$2 sm:$0xff]  ;;  %v1137_v62 = vld [vmem:[#allocation2 + $0x20] ss:$2 sm:$0xff] }
  0xd9   : > { %v1053_v37 = vpop.f32.mrf.mxu3  ;;  %1124 = vst.msk [vmem:[#allocation2 + $0x30] sm:$0xff] %vm1117_vm4, %v1109_v34  ;;  %v897_v38 = vadd.f32 %v872_v36, %v663_v35  ;;  %v665_v40 = vpop.f32.mrf.mxu1  ;;  %v1392_v51 = vld [vmem:[#allocation2 + $0x1b] ss:$2 sm:$0xff]  ;;  %v1459_v52 = vld [vmem:[#allocation2 + $0x1c] ss:$2 sm:$0xff] }
  0xda   : > { %v666_v43 = vadd.f32 %v665_v40, %v583_v39 }
  0xdb   : > { %v1078_v41 = vadd.f32 %v1053_v37, %v897_v38 }
  0xdd   : > { %v1096_v42 = vadd.f32 %v5280_v22, %v1078_v41 }
  0xdf   : > { %v1110_v44 = vmax.f32 %v1096_v42, 0.0 }
  0xe0   : > { %v875_v45 = vpop.f32.mrf.mxu2  ;;  %v585_v48 = vpop.f32.mrf.mxu0  ;;  %v1260_v9 = vld [vmem:[#allocation2 + $0x22] ss:$2 sm:$0xff]  ;;  %v1327_v13 = vld [vmem:[#allocation2 + $0x23] ss:$2 sm:$0xff] }
  0xe1   : > { %v1056_v46 = vpop.f32.mrf.mxu3  ;;  %1125 = vst.msk [vmem:[#allocation2 + $0x38] sm:$0xff] %vm1117_vm4, %v1110_v44  ;;  %v898_v47 = vadd.f32 %v875_v45, %v666_v43  ;;  %v667_v49 = vpop.f32.mrf.mxu1 }
  0xe2   : > { %v668_v57 = vadd.f32 %v667_v49, %v585_v48 }
  0xe3   : > { %v1079_v54 = vadd.f32 %v1056_v46, %v898_v47 }
  0xe5   : > { %v1097_v55 = vadd.f32 %v5280_v22, %v1079_v54  ;;  %v1390_v54 = vld [vmem:[#allocation2 + $0xb] ss:$2 sm:$0xff] }
  0xe7   : > { %v1111_v56 = vmax.f32 %v1097_v55, 0.0  ;;  %v1457_v55 = vld [vmem:[#allocation2 + $0xc] ss:$2 sm:$0xff] }
  0xe8   : > { %v877_v59 = vpop.f32.mrf.mxu2  ;;  %v1156_v61 = vld [vmem:[#allocation2 + $0x31] ss:$2 sm:$0xff]  ;;  %v1139_v63 = vld [vmem:[#allocation2 + $0x30] ss:$2 sm:$0xff]  ;;  %v588_v3 = vpop.f32.mrf.mxu0 }
  0xe9   : > { %v1058_v60 = vpop.f32.mrf.mxu3  ;;  %1126 = vst.msk [vmem:[#allocation2 + $0x40] sm:$0xff] %vm1117_vm4, %v1111_v56  ;;  %v899_v0 = vadd.f32 %v877_v59, %v668_v57  ;;  %v1160_v1 = vpack.c.bf16 %v1156_v61, %v1154_v58  ;;  %v1143_v2 = vpack.c.bf16 %v1139_v63, %v1137_v62  ;;  %v670_v4 = vpop.f32.mrf.mxu1  ;;  %v1399_v56 = vpack.c.bf16 %v1392_v51, %v1390_v54  ;;  %v4889_v58 = vld [vmem:[%s6199_s3 + $0xa0] sm:$0xff]  ;;  %v4887_v61 = vld [vmem:[%s6199_s3 + $0x90] sm:$0xff] }
  0xea   : > { %v671_v7 = vadd.f32 %v670_v4, %v588_v3  ;;  %v1466_v57 = vpack.c.bf16 %v1459_v52, %v1457_v55  ;;  %v4885_v59 = vld [vmem:[%s6199_s3 + $0x80] sm:$0xff]  ;;  %1837 = vmatpush.bf16.msrb.mxu2 %v4889_v58  ;;  %1770 = vmatpush.bf16.msrb.mxu1 %v4887_v61  ;;  %v4895_v52 = vld [vmem:[%s6199_s3 + $0xd0] sm:$0xff] }
  0xeb   : > { %v1080_v5 = vadd.f32 %v1058_v60, %v899_v0  ;;  %3941 = vmatmul.msk.bf16.gmra.mxu0 %vm1117_vm4, %v1160_v1  ;;  %3952 = vmatmul.msk.bf16.gmra.mxu1 %vm1117_vm4, %v1143_v2  ;;  %v4891_v60 = vld [vmem:[%s6199_s3 + $0xb0] sm:$0xff]  ;;  %v1526_v62 = vld [vmem:[#allocation2 + $0x1d] ss:$2 sm:$0xff]  ;;  %v1593_v63 = vld [vmem:[#allocation2 + $0x1e] ss:$2 sm:$0xff] }
  0xec   : > { %1703 = vmatpush.bf16.msrb.mxu0 %v4885_v59  ;;  %1904 = vmatpush.bf16.msrb.mxu3 %v4891_v60  ;;  %v1524_v0 = vld [vmem:[#allocation2 + $0xd] ss:$2 sm:$0xff]  ;;  %v1591_v1 = vld [vmem:[#allocation2 + $0xe] ss:$2 sm:$0xff] }
  0xed   : > { %v1098_v6 = vadd.f32 %v5280_v22, %v1080_v5  ;;  %v1533_v2 = vpack.c.bf16 %v1526_v62, %v1524_v0  ;;  %v1600_v3 = vpack.c.bf16 %v1593_v63, %v1591_v1 }
  0xef   : > { %v1112_v8 = vmax.f32 %v1098_v6, 0.0  ;;  %v1394_v6 = vld [vmem:[#allocation2 + $0x2b] ss:$2 sm:$0xff] }
  0xf0   : > { %v880_v10 = vpop.f32.mrf.mxu2  ;;  %v1262_v12 = vld [vmem:[#allocation2 + $0x32] ss:$2 sm:$0xff]  ;;  %v1329_v14 = vld [vmem:[#allocation2 + $0x33] ss:$2 sm:$0xff]  ;;  %v590_v18 = vpop.f32.mrf.mxu0 }
  0xf1   : > { %v1061_v11 = vpop.f32.mrf.mxu3  ;;  %1127 = vst.msk [vmem:[#allocation2 + $0x48] sm:$0xff] %vm1117_vm4, %v1112_v8  ;;  %v900_v15 = vadd.f32 %v880_v10, %v671_v7  ;;  %v1266_v16 = vpack.c.bf16 %v1262_v12, %v1260_v9  ;;  %v1333_v17 = vpack.c.bf16 %v1329_v14, %v1327_v13  ;;  %v672_v19 = vpop.f32.mrf.mxu1  ;;  %v1461_v7 = vld [vmem:[#allocation2 + $0x2c] ss:$2 sm:$0xff]  ;;  %v1528_v12 = vld [vmem:[#allocation2 + $0x2d] ss:$2 sm:$0xff] }
  0xf2   : > { %v673_v27 = vadd.f32 %v672_v19, %v590_v18  ;;  %v1595_v13 = vld [vmem:[#allocation2 + $0x2e] ss:$2 sm:$0xff]  ;;  %v1729_v58 = vld [vmem:[#allocation2 + $0x37] ss:$2 sm:$0xff] }
  0xf3   : > { %v1081_v20 = vadd.f32 %v1061_v11, %v900_v15  ;;  %3967 = vmatmul.msk.bf16.gmra.mxu2 %vm1117_vm4, %v1266_v16  ;;  %3982 = vmatmul.msk.bf16.gmra.mxu3 %vm1117_vm4, %v1333_v17  ;;  %v4898_v16 = vld [vmem:[%s6199_s3 + $0xe8] sm:$0xff]  ;;  %v4900_v18 = vld [vmem:[%s6199_s3 + $0xf8] sm:$0xff] }
  0xf4   : > { %v4894_v17 = vld [vmem:[%s6199_s3 + $0xc8] sm:$0xff]  ;;  %v4896_v19 = vld [vmem:[%s6199_s3 + $0xd8] sm:$0xff] }
  0xf5   : > { %v1099_v26 = vadd.f32 %v5280_v22, %v1081_v20  ;;  %v1796_v0 = vld [vmem:[#allocation2 + $0x38] ss:$2 sm:$0xff]  ;;  %v1863_v1 = vld [vmem:[#allocation2 + $0x39] ss:$2 sm:$0xff] }
  0xf7   : > { %v1113_v28 = vmax.f32 %v1099_v26, 0.0 }
  0xf8   : > { %v882_v29 = vpop.f32.mrf.mxu2  ;;  %v1158_v31 = vld [vmem:[#allocation2 + $0x41] ss:$2 sm:$0x1f]  ;;  %v1141_v32 = vld [vmem:[#allocation2 + $0x40] ss:$2 sm:$0x1f]  ;;  %v593_v36 = vpop.f32.mrf.mxu0 }
  0xf9   : > { %v1063_v30 = vpop.f32.mrf.mxu3  ;;  %1128 = vst.msk [vmem:[#allocation2 + $0x50] sm:$0xff] %vm1117_vm4, %v1113_v28  ;;  %v901_v33 = vadd.f32 %v882_v29, %v673_v27  ;;  %v1161_v34 = vpack.c.bf16 %v1158_v31, %v1158_v31  ;;  %v1144_v35 = vpack.c.bf16 %v1141_v32, %v1141_v32  ;;  %v675_v37 = vpop.f32.mrf.mxu1  ;;  %v1264_v41 = vld [vmem:[#allocation2 + $0x42] ss:$2 sm:$0x1f]  ;;  %v1396_v4 = vld [vmem:[#allocation2 + $0x3b] ss:$2 sm:$0xff] }
  0xfa   : > { %v676_v40 = vadd.f32 %v675_v37, %v593_v36  ;;  %v1331_v42 = vld [vmem:[#allocation2 + $0x43] ss:$2 sm:$0x1f]  ;;  %v1267_v47 = vpack.c.bf16 %v1264_v41, %v1264_v41  ;;  %v1463_v5 = vld [vmem:[#allocation2 + $0x3c] ss:$2 sm:$0xff]  ;;  %v1400_v8 = vpack.c.bf16 %v1396_v4, %v1394_v6 }
  0xfb   : > { %v1082_v38 = vadd.f32 %v1063_v30, %v901_v33  ;;  %3942 = vmatmul.msk.bf16.gmra.mxu0 %vm1117_vm4, %v1161_v34  ;;  %3953 = vmatmul.msk.bf16.gmra.mxu1 %vm1117_vm4, %v1144_v35  ;;  %v1334_v48 = vpack.c.bf16 %v1331_v42, %v1331_v42  ;;  %v1467_v9 = vpack.c.bf16 %v1463_v5, %v1461_v7  ;;  %v1530_v10 = vld [vmem:[#allocation2 + $0x3d] ss:$2 sm:$0xff]  ;;  %v1597_v11 = vld [vmem:[#allocation2 + $0x3e] ss:$2 sm:$0xff] }
  0xfc   : > { %v1534_v14 = vpack.c.bf16 %v1530_v10, %v1528_v12  ;;  %v1601_v15 = vpack.c.bf16 %v1597_v11, %v1595_v13  ;;  %v1725_v41 = vld [vmem:[#allocation2 + $0x17] ss:$2 sm:$0xff] }
  0xfd   : > { %v1100_v39 = vadd.f32 %v5280_v22, %v1082_v38  ;;  %v1660_v38 = vld [vmem:[#allocation2 + $0x26] ss:$2 sm:$0xff] }
  0xff   : > { %v1114_v43 = vmax.f32 %v1100_v39, 0.0  ;;  %v1727_v39 = vld [vmem:[#allocation2 + $0x27] ss:$2 sm:$0xff] }
 0x100   : > { %v885_v44 = vpop.f32.mrf.mxu2  ;;  %v1398_v20 = vld [vmem:[#allocation2 + $0x4b] ss:$2 sm:$0x1f]  ;;  %v1465_v21 = vld [vmem:[#allocation2 + $0x4c] ss:$2 sm:$0x1f]  ;;  %v595_v23 = vpop.f32.mrf.mxu0 }
 0x101   : > { %v1066_v45 = vpop.f32.mrf.mxu3  ;;  %1129 = vst.msk [vmem:[#allocation2 + $0x58] sm:$0xff] %vm1117_vm4, %v1114_v43  ;;  %v902_v46 = vadd.f32 %v885_v44, %v676_v40  ;;  %v677_v24 = vpop.f32.mrf.mxu1  ;;  %v1401_v26 = vpack.c.bf16 %v1398_v20, %v1398_v20  ;;  %v1468_v27 = vpack.c.bf16 %v1465_v21, %v1465_v21  ;;  %v1532_v31 = vld [vmem:[#allocation2 + $0x4d] ss:$2 sm:$0x1f]  ;;  %v1658_v40 = vld [vmem:[#allocation2 + $0x16] ss:$2 sm:$0xff]  ;;  %v1734_v43 = vpack.c.bf16 %v1727_v39, %v1725_v41 }
 0x102   : > { %v678_v25 = vadd.f32 %v677_v24, %v595_v23  ;;  %v1599_v32 = vld [vmem:[#allocation2 + $0x4e] ss:$2 sm:$0x1f]  ;;  %v1535_v35 = vpack.c.bf16 %v1532_v31, %v1532_v31  ;;  %v1667_v42 = vpack.c.bf16 %v1660_v38, %v1658_v40  ;;  %v4893_v44 = vld [vmem:[%s6199_s3 + $0xc0] sm:$0xff]  ;;  %v1865_v63 = vld [vmem:[#allocation2 + $0x49] ss:$2 sm:$0xff] }
 0x103   : > { %v1083_v49 = vadd.f32 %v1066_v45, %v902_v46  ;;  %3968 = vmatmul.msk.bf16.gmra.mxu2 %vm1117_vm4, %v1267_v47  ;;  %3983 = vmatmul.msk.bf16.gmra.mxu3 %vm1117_vm4, %v1334_v48  ;;  %v1602_v36 = vpack.c.bf16 %v1599_v32, %v1599_v32  ;;  %v4899_v45 = vld [vmem:[%s6199_s3 + $0xf0] sm:$0xff]  ;;  %v1792_v48 = vld [vmem:[#allocation2 + $0x18] ss:$2 sm:$0xff]  ;;  %v1925_v23 = vld [vmem:[#allocation2 + $0x21] ss:$2 sm:$0xff] }
 0x104   : > { %v1794_v46 = vld [vmem:[#allocation2 + $0x28] ss:$2 sm:$0xff]  ;;  %v1861_v47 = vld [vmem:[#allocation2 + $0x29] ss:$2 sm:$0xff] }
 0x105   : > { %v1101_v50 = vadd.f32 %v5280_v22, %v1083_v49  ;;  %v1859_v49 = vld [vmem:[#allocation2 + $0x19] ss:$2 sm:$0xff]  ;;  %v1798_v62 = vld [vmem:[#allocation2 + $0x48] ss:$2 sm:$0xff] }
 0x106   : > { %v1868_v51 = vpack.c.bf16 %v1861_v47, %v1859_v49  ;;  %v1731_v54 = vld [vmem:[#allocation2 + $0x47] ss:$2 sm:$0xff]  ;;  %v1989_v24 = vld [vmem:[#allocation2 + $0x22] ss:$2 sm:$0xff] }
 0x107   : > { %v1115_v53 = vmax.f32 %v1101_v50, 0.0  ;;  %v1801_v50 = vpack.c.bf16 %v1794_v46, %v1792_v48  ;;  %v1735_v61 = vpack.c.bf16 %v1731_v54, %v1729_v58  ;;  %v2120_v31 = vld [vmem:[#allocation2 + $0x34] ss:$2 sm:$0xff] }
 0x108   : > { %v887_v28 = vpop.f32.mrf.mxu2  ;;  %v1666_v5 = vld [vmem:[#allocation2 + $0x56] ss:$2 sm:$0x1f]  ;;  %v1733_v6 = vld [vmem:[#allocation2 + $0x57] ss:$2 sm:$0x1f] }
 0x109   : > { %1130 = vst.msk [vmem:[#allocation2 + $0x60] sm:$0xff] %vm1117_vm4, %v1115_v53  ;;  %v903_v29 = vadd.f32 %v887_v28, %v678_v25  ;;  %v1068_v30 = vpop.f32.mrf.mxu3  ;;  %v1664_v53 = vld [vmem:[#allocation2 + $0x46] ss:$2 sm:$0xff]  ;;  %v1669_v10 = vpack.c.bf16 %v1666_v5, %v1666_v5  ;;  %v1736_v11 = vpack.c.bf16 %v1733_v6, %v1733_v6  ;;  %v1929_v40 = vld [vmem:[#allocation2 + $0x51] ss:$2 sm:$0xff] }
 0x10b   : > { %3996 = vmatmul.msk.bf16.vlgmr.msra.gmra.mxu0 %vm1117_vm4, %v1399_v56  ;;  %4011 = vmatmul.msk.bf16.vlgmr.msra.gmra.mxu1 %vm1117_vm4, %v1466_v57  ;;  %v1084_v33 = vadd.f32 %v1068_v30, %v903_v29  ;;  %v1662_v57 = vld [vmem:[#allocation2 + $0x36] ss:$2 sm:$0xff]  ;;  %v2054_v30 = vld [vmem:[#allocation2 + $0x33] ss:$2 sm:$0xff] }
 0x10c   : > { %1967 = vmatpush.bf16.msra.mxu0 %v4894_v17  ;;  %2031 = vmatpush.bf16.msra.mxu1 %v4896_v19  ;;  %v1668_v60 = vpack.c.bf16 %v1664_v53, %v1662_v57  ;;  %v1990_v19 = vld [vmem:[#allocation2 + $0x32] ss:$2 sm:$0xff] }
 0x10d   : > { %v1102_v34 = vadd.f32 %v5280_v22, %v1084_v33  ;;  %v4897_v22 = vld [vmem:[%s6199_s3 + $0xe0] sm:$0xff] }
 0x10e   : > { %v2122_v57 = vld [vmem:[#allocation2 + $0x44] ss:$2 sm:$0xff] }
 0x10f   : > { %v1116_v37 = vmax.f32 %v1102_v34, 0.0  ;;  %v2053_v34 = vld [vmem:[#allocation2 + $0x23] ss:$2 sm:$0xff] }
 0x110   : > { %1968 = vmatpush.bf16.msra.mxu0 %v4893_v44  ;;  %2032 = vmatpush.bf16.msra.mxu1 %v4895_v52  ;;  %v1800_v12 = vld [vmem:[#allocation2 + $0x58] ss:$2 sm:$0x1f]  ;;  %v1867_v13 = vld [vmem:[#allocation2 + $0x59] ss:$2 sm:$0x1f] }
 0x111   : > { %1132 = vst.msk [vmem:[#allocation2 + $0x68] sm:$0x1f] %vm1131_vm5, %v1116_v37  ;;  %v1870_v17 = vpack.c.bf16 %v1867_v13, %v1867_v13  ;;  %v1993_v41 = vld [vmem:[#allocation2 + $0x52] ss:$2 sm:$0xff]  ;;  %v1927_v44 = vld [vmem:[#allocation2 + $0x41] ss:$2 sm:$0xff] }
 0x112   : > { %v1933_v48 = vpack.c.bf16 %v1929_v40, %v1927_v44  ;;  %v2057_v52 = vld [vmem:[#allocation2 + $0x53] ss:$2 sm:$0xff]  ;;  %v2124_v53 = vld [vmem:[#allocation2 + $0x54] ss:$2 sm:$0xff] }
 0x113   : > { %4026 = vmatmul.msk.bf16.vlgmr.msra.gmra.mxu2 %vm1117_vm4, %v1533_v2  ;;  %4041 = vmatmul.msk.bf16.vlgmr.msra.gmra.mxu3 %vm1117_vm4, %v1600_v3  ;;  %v1802_v2 = vpack.c.bf16 %v1798_v62, %v1796_v0  ;;  %v1869_v3 = vpack.c.bf16 %v1865_v63, %v1863_v1 }
 0x114   : > { %2095 = vmatpush.bf16.msra.mxu2 %v4898_v16  ;;  %2162 = vmatpush.bf16.msra.mxu3 %v4900_v18  ;;  %v1803_v16 = vpack.c.bf16 %v1800_v12, %v1800_v12  ;;  %v1926_v18 = vld [vmem:[#allocation2 + $0x31] ss:$2 sm:$0xff] }
 0x118   : > { %2096 = vmatpush.bf16.msra.mxu2 %v4897_v22  ;;  %2163 = vmatpush.bf16.msra.mxu3 %v4899_v45  ;;  %v1991_v45 = vld [vmem:[#allocation2 + $0x42] ss:$2 sm:$0xff]  ;;  %v1931_v62 = vld [vmem:[#allocation2 + $0x61] ss:$2 sm:$0x1f] }
 0x119   : > { %v1997_v49 = vpack.c.bf16 %v1993_v41, %v1991_v45  ;;  %v1995_v63 = vld [vmem:[#allocation2 + $0x62] ss:$2 sm:$0x1f]  ;;  %v1934_v5 = vpack.c.bf16 %v1931_v62, %v1931_v62 }
 0x11a   : > { %v1998_v6 = vpack.c.bf16 %v1995_v63, %v1995_v63  ;;  %v2126_v12 = vld [vmem:[#allocation2 + $0x64] ss:$2 sm:$0x1f]  ;;  %v4912_v63 = vld [vmem:[%s6201_s5 + $0x58] sm:$0xff] }
 0x11b   : > { %3997 = vmatmul.msk.bf16.gmra.mxu0 %vm1117_vm4, %v1400_v8  ;;  %4012 = vmatmul.msk.bf16.gmra.mxu1 %vm1117_vm4, %v1467_v9 }
 0x123   : > { %4027 = vmatmul.msk.bf16.gmra.mxu2 %vm1117_vm4, %v1534_v14  ;;  %4042 = vmatmul.msk.bf16.gmra.mxu3 %vm1117_vm4, %v1601_v15 }
 0x12b   : > { %3998 = vmatmul.msk.bf16.gmra.mxu0 %vm1117_vm4, %v1401_v26  ;;  %4013 = vmatmul.msk.bf16.gmra.mxu1 %vm1117_vm4, %v1468_v27  ;;  %v1932_v26 = vpack.c.bf16 %v1926_v18, %v1925_v23  ;;  %v1996_v27 = vpack.c.bf16 %v1990_v19, %v1989_v24  ;;  %v2129_v18 = vpack.c.bf16 %v2126_v12, %v2126_v12 }
 0x133   : > { %4028 = vmatmul.msk.bf16.gmra.mxu2 %vm1117_vm4, %v1535_v35  ;;  %4043 = vmatmul.msk.bf16.gmra.mxu3 %vm1117_vm4, %v1602_v36  ;;  %v2118_v35 = vld [vmem:[#allocation2 + $0x24] ss:$2 sm:$0xff]  ;;  %v2060_v36 = vpack.c.bf16 %v2054_v30, %v2053_v34 }
 0x134   : > { %v2127_v37 = vpack.c.bf16 %v2120_v31, %v2118_v35 }
 0x13b   : > { %4056 = vmatmul.msk.bf16.vlgmr.msrb.gmra.mxu0 %vm1117_vm4, %v1667_v42  ;;  %4071 = vmatmul.msk.bf16.vlgmr.msrb.gmra.mxu1 %vm1117_vm4, %v1734_v43 }
 0x143   : > { %4086 = vmatmul.msk.bf16.vlgmr.msrb.gmra.mxu2 %vm1117_vm4, %v1801_v50  ;;  %4101 = vmatmul.msk.bf16.vlgmr.msrb.gmra.mxu3 %vm1117_vm4, %v1868_v51 }
 0x144   : > { %2352 = vmatpush.bf16.msrb.mxu2 %v4912_v63 }
 0x148   : > { %v1197_v55 = vpop.f32.mrf.mxu0  ;;  %v1241_v56 = vpop.f32.mrf.mxu1 }
 0x149   : > { %v1242_v59 = vadd.f32 %v1241_v56, %v1197_v55  ;;  %v2055_v56 = vld [vmem:[#allocation2 + $0x43] ss:$2 sm:$0xff] }
 0x14a   : > { %v2061_v58 = vpack.c.bf16 %v2057_v52, %v2055_v56 }
 0x14b   : > { %4057 = vmatmul.msk.bf16.gmra.mxu0 %vm1117_vm4, %v1668_v60  ;;  %4072 = vmatmul.msk.bf16.gmra.mxu1 %vm1117_vm4, %v1735_v61 }
 0x150   : > { %v5417_v14 = vpop.f32.mrf.mxu0  ;;  %v5419_v15 = vpop.f32.mrf.mxu1 }
 0x153   : > { %4087 = vmatmul.msk.bf16.gmra.mxu2 %vm1117_vm4, %v1802_v2  ;;  %4102 = vmatmul.msk.bf16.gmra.mxu3 %vm1117_vm4, %v1869_v3 }
 0x156   : > { %v1303_v4 = vpop.f32.mrf.mxu2  ;;  %v1370_v8 = vpop.f32.mrf.mxu3 }
 0x157   : > { %v1317_v7 = vadd.f32 %v1303_v4, %v1242_v59  ;;  %v2128_v59 = vpack.c.bf16 %v2124_v53, %v2122_v57 }
 0x159   : > { %v5413_v9 = vadd.f32 %v1370_v8, %v1317_v7 }
 0x15b   : > { %4058 = vmatmul.msk.bf16.gmra.mxu0 %vm1117_vm4, %v1669_v10  ;;  %4073 = vmatmul.msk.bf16.gmra.mxu1 %vm1117_vm4, %v1736_v11  ;;  %v2059_v11 = vld [vmem:[#allocation2 + $0x63] ss:$2 sm:$0x1f] }
 0x15e   : > { %v5425_v28 = vpop.f32.mrf.mxu2  ;;  %v5427_v29 = vpop.f32.mrf.mxu3 }
 0x163   : > { %4088 = vmatmul.msk.bf16.gmra.mxu2 %vm1117_vm4, %v1803_v16  ;;  %4103 = vmatmul.msk.bf16.gmra.mxu3 %vm1117_vm4, %v1870_v17  ;;  %v2062_v17 = vpack.c.bf16 %v2059_v11, %v2059_v11 }
 0x168   : > { %v1202_v20 = vpop.f32.mrf.mxu0  ;;  %v1246_v21 = vpop.f32.mrf.mxu1 }
 0x169   : > { %v1247_v25 = vadd.f32 %v1246_v21, %v1202_v20 }
 0x16b   : > { %4116 = vmatmul.msk.bf16.vlgmr.msra.gmra.mxu0 %vm1117_vm4, %v1932_v26  ;;  %4131 = vmatmul.msk.bf16.vlgmr.msra.gmra.mxu1 %vm1117_vm4, %v1996_v27 }
 0x170   : > { %v5429_v32 = vpop.f32.mrf.mxu0  ;;  %v5431_v33 = vpop.f32.mrf.mxu1 }
 0x173   : > { %4146 = vmatmul.msk.bf16.vlgmr.msra.gmra.mxu2 %vm1117_vm4, %v2060_v36  ;;  %4161 = vmatmul.msk.bf16.vlgmr.msra.gmra.mxu3 %vm1117_vm4, %v2127_v37 }
 0x176   : > { %v1308_v38 = vpop.f32.mrf.mxu2  ;;  %v1375_v39 = vpop.f32.mrf.mxu3 }
 0x177   : > { %v1319_v42 = vadd.f32 %v1308_v38, %v1247_v25 }
 0x178   : > { %v1207_v43 = vpop.f32.mrf.mxu0  ;;  %v1251_v22 = vpop.f32.mrf.mxu1 }
 0x179   : > { %v1386_v46 = vadd.f32 %v1375_v39, %v1319_v42  ;;  %v1252_v47 = vadd.f32 %v1251_v22, %v1207_v43 }
 0x17b   : > { %4117 = vmatmul.msk.bf16.gmra.mxu0 %vm1117_vm4, %v1933_v48  ;;  %4132 = vmatmul.msk.bf16.gmra.mxu1 %vm1117_vm4, %v1997_v49 }
 0x17e   : > { %v5437_v50 = vpop.f32.mrf.mxu2  ;;  %v5439_v51 = vpop.f32.mrf.mxu3 }
 0x180   : > { %v1209_v54 = vpop.f32.mrf.mxu0  ;;  %v1253_v55 = vpop.f32.mrf.mxu1 }
 0x183   : > { %4147 = vmatmul.msk.bf16.gmra.mxu2 %vm1117_vm4, %v2061_v58  ;;  %4162 = vmatmul.msk.bf16.gmra.mxu3 %vm1117_vm4, %v2128_v59  ;;  %v4908_v58 = vld [vmem:[%s6201_s5 + $0x38] sm:$0xff] }
 0x184   : > { %2258 = vmatpush.bf16.msrb.mxu0 %v4908_v58 }
 0x186   : > { %v1313_v60 = vpop.f32.mrf.mxu2  ;;  %v1380_v61 = vpop.f32.mrf.mxu3 }
 0x187   : > { %v1321_v0 = vadd.f32 %v1313_v60, %v1252_v47 }
 0x188   : > { %v1437_v1 = vpop.f32.mrf.mxu0  ;;  %v1504_v2 = vpop.f32.mrf.mxu1 }
 0x189   : > { %v1388_v3 = vadd.f32 %v1380_v61, %v1321_v0  ;;  %v1451_v4 = vadd.f32 %v1437_v1, %v5413_v9  ;;  %v4916_v0 = vld [vmem:[%s6201_s5 + $0x78] sm:$0xff] }
 0x18a   : > { %v4904_v1 = vld [vmem:[%s6201_s5 + $0x18] sm:$0xff]  ;;  %2407 = vmatpush.bf16.msrb.mxu3 %v4916_v0 }
 0x18b   : > { %v1518_v7 = vadd.f32 %v1504_v2, %v1451_v4  ;;  %4118 = vmatmul.msk.bf16.gmra.mxu0 %vm1117_vm4, %v1934_v5  ;;  %4133 = vmatmul.msk.bf16.gmra.mxu1 %vm1117_vm4, %v1998_v6  ;;  %v4907_v4 = vld [vmem:[%s6201_s5 + $0x30] sm:$0xff] }
 0x18c   : > { %2299 = vmatpush.bf16.msrb.mxu1 %v4904_v1  ;;  %2259 = vmatpush.bf16.msrb.mxu0 %v4907_v4 }
 0x18e   : > { %v1315_v8 = vpop.f32.mrf.mxu2  ;;  %v1382_v10 = vpop.f32.mrf.mxu3 }
 0x190   : > { %v5446_v13 = vpop.f32.mrf.mxu0  ;;  %v5448_v16 = vpop.f32.mrf.mxu1 }
 0x193   : > { %4148 = vmatmul.msk.bf16.gmra.mxu2 %vm1117_vm4, %v2062_v17  ;;  %4163 = vmatmul.msk.bf16.gmra.mxu3 %vm1117_vm4, %v2129_v18  ;;  %v1244_v17 = vadd.f32 %v5419_v15, %v5417_v14  ;;  %v4906_v14 = vld [vmem:[%s6201_s5 + $0x28] sm:$0xff] }
 0x194   : > { %2260 = vmatpush.bf16.msrb.mxu0 %v4906_v14 }
 0x195   : > { %v1318_v18 = vadd.f32 %v5425_v28, %v1244_v17  ;;  %v5572_v17 = vld [vmem:[%s6200_s4] ss:$0 sm:$0xff] }
 0x196   : > { %v1571_v9 = vpop.f32.mrf.mxu2  ;;  %v1638_v19 = vpop.f32.mrf.mxu3 }
 0x197   : > { %v1585_v20 = vadd.f32 %v1571_v9, %v1518_v7  ;;  %v4911_v7 = vld [vmem:[%s6201_s5 + $0x50] sm:$0xff] }
 0x198   : > { %v1442_v21 = vpop.f32.mrf.mxu0  ;;  %v1509_v23 = vpop.f32.mrf.mxu1  ;;  %2353 = vmatpush.bf16.msrb.mxu2 %v4911_v7 }
 0x199   : > { %v5452_v24 = vadd.f32 %v1638_v19, %v1585_v20  ;;  %v1453_v25 = vadd.f32 %v1442_v21, %v1386_v46  ;;  %v1385_v20 = vadd.f32 %v5427_v29, %v1318_v18  ;;  %v4915_v21 = vld [vmem:[%s6201_s5 + $0x70] sm:$0xff] }
 0x19a   : > { %2408 = vmatpush.bf16.msrb.mxu3 %v4915_v21  ;;  %v4919_v18 = vld [vmem:[%s6201_s5 + $0x90] sm:$0xff] }
 0x19b   : > { %v1520_v26 = vadd.f32 %v1509_v23, %v1453_v25  ;;  %v4903_v23 = vld [vmem:[%s6201_s5 + $0x10] sm:$0xff]  ;;  %v1452_v25 = vadd.f32 %v5446_v13, %v1385_v20  ;;  %v4914_v13 = vld [vmem:[%s6201_s5 + $0x68] sm:$0xff] }
 0x19c   : > { %2300 = vmatpush.bf16.msrb.mxu1 %v4903_v23 }
 0x19d   : > { %v1519_v29 = vadd.f32 %v5448_v16, %v1452_v25  ;;  %v4902_v16 = vld [vmem:[%s6201_s5 + $0x8] sm:$0xff] }
 0x19e   : > { %v5454_v27 = vpop.f32.mrf.mxu2  ;;  %v5456_v30 = vpop.f32.mrf.mxu3  ;;  %2409 = vmatpush.bf16.msrb.mxu3 %v4914_v13  ;;  %v4918_v25 = vld [vmem:[%s6201_s5 + $0x88] sm:$0xff] }
 0x1a0   : > { %v5458_v31 = vpop.f32.mrf.mxu0  ;;  %v5460_v34 = vpop.f32.mrf.mxu1  ;;  %2301 = vmatpush.bf16.msrb.mxu1 %v4902_v16 }
 0x1a6   : > { %v1576_v35 = vpop.f32.mrf.mxu2  ;;  %v1643_v36 = vpop.f32.mrf.mxu3 }
 0x1a7   : > { %v1587_v37 = vadd.f32 %v1576_v35, %v1520_v26 }
 0x1a8   : > { %v1447_v38 = vpop.f32.mrf.mxu0  ;;  %v1514_v39 = vpop.f32.mrf.mxu1 }
 0x1a9   : > { %v5462_v40 = vadd.f32 %v1643_v36, %v1587_v37  ;;  %v1455_v41 = vadd.f32 %v1447_v38, %v1388_v3  ;;  %v1586_v37 = vadd.f32 %v5454_v27, %v1519_v29  ;;  %v4910_v38 = vld [vmem:[%s6201_s5 + $0x48] sm:$0xff] }
 0x1aa   : > { %2354 = vmatpush.bf16.msrb.mxu2 %v4910_v38 }
 0x1ab   : > { %v1522_v42 = vadd.f32 %v1514_v39, %v1455_v41  ;;  %v1249_v41 = vadd.f32 %v5431_v33, %v5429_v32  ;;  %v4909_v32 = vld [vmem:[%s6201_s5 + $0x40] sm:$0xff] }
 0x1ad   : > { %v1320_v27 = vadd.f32 %v5437_v50, %v1249_v41  ;;  %v4901_v50 = vld [vmem:[%s6201_s5] sm:$0xff] }
 0x1ae   : > { %v5464_v43 = vpop.f32.mrf.mxu2  ;;  %v5466_v22 = vpop.f32.mrf.mxu3  ;;  %2355 = vmatpush.bf16.msrb.mxu2 %v4909_v32  ;;  %2302 = vmatpush.bf16.msrb.mxu1 %v4901_v50 }
 0x1b0   : > { %v1449_v44 = vpop.f32.mrf.mxu0  ;;  %v1516_v45 = vpop.f32.mrf.mxu1 }
 0x1b1   : > { %v1653_v44 = vadd.f32 %v5456_v30, %v1586_v37 }
 0x1b6   : > { %v1581_v46 = vpop.f32.mrf.mxu2  ;;  %v1648_v47 = vpop.f32.mrf.mxu3 }
 0x1b7   : > { %v1589_v48 = vadd.f32 %v1581_v46, %v1522_v42 }
 0x1b8   : > { %v1705_v49 = vpop.f32.mrf.mxu0  ;;  %v1772_v52 = vpop.f32.mrf.mxu1 }
 0x1b9   : > { %v5468_v53 = vadd.f32 %v1648_v47, %v1589_v48  ;;  %v1719_v26 = vadd.f32 %v1705_v49, %v5452_v24  ;;  %v1387_v49 = vadd.f32 %v5439_v51, %v1320_v27 }
 0x1bb   : > { %v1786_v42 = vadd.f32 %v1772_v52, %v1719_v26  ;;  %v1454_v30 = vadd.f32 %v5458_v31, %v1387_v49  ;;  %v4930_v49 = vld [vmem:[%s6201_s5 + $0xe8] sm:$0xff] }
 0x1bd   : > { %v1521_v63 = vadd.f32 %v5460_v34, %v1454_v30  ;;  %v4913_v34 = vld [vmem:[%s6201_s5 + $0x60] sm:$0xff] }
 0x1be   : > { %v1583_v54 = vpop.f32.mrf.mxu2  ;;  %v1650_v55 = vpop.f32.mrf.mxu3  ;;  %2410 = vmatpush.bf16.msrb.mxu3 %v4913_v34  ;;  %v4929_v30 = vld [vmem:[%s6201_s5 + $0xe0] sm:$0xff] }
 0x1bf   : > { %v4905_v55 = vld [vmem:[%s6201_s5 + $0x20] sm:$0xff] }
 0x1c0   : > { %v1707_v56 = vpop.f32.mrf.mxu0  ;;  %v5470_v57 = vpop.f32.mrf.mxu1  ;;  %2261 = vmatpush.bf16.msrb.mxu0 %v4905_v55 }
 0x1c1   : > { %v1720_v46 = vadd.f32 %v1707_v56, %v1653_v44 }
 0x1c3   : > { %v1787_v56 = vadd.f32 %v5470_v57, %v1720_v46  ;;  %v4926_v46 = vld [vmem:[%s6201_s5 + $0xc8] sm:$0xff] }
 0x1c6   : > { %v1839_v59 = vpop.f32.mrf.mxu2  ;;  %v1906_v60 = vpop.f32.mrf.mxu3 }
 0x1c7   : > { %v1853_v45 = vadd.f32 %v1839_v59, %v1786_v42  ;;  %v4920_v59 = vld [vmem:[%s6201_s5 + $0x98] sm:$0xff] }
 0x1c8   : > { %v5475_v61 = vpop.f32.mrf.mxu0  ;;  %v5477_v62 = vpop.f32.mrf.mxu1  ;;  %2462 = vmatpush.bf16.msra.mxu0 %v4920_v59 }
 0x1c9   : > { %v1920_v54 = vadd.f32 %v1906_v60, %v1853_v45  ;;  %v4924_v60 = vld [vmem:[%s6201_s5 + $0xb8] sm:$0xff]  ;;  %v1721_v31 = vadd.f32 %v5475_v61, %v5462_v40 }
 0x1ca   : > { %2517 = vmatpush.bf16.msra.mxu1 %v4924_v60 }
 0x1cc   : > { %2463 = vmatpush.bf16.msra.mxu0 %v4919_v18 }
 0x1ce   : > { %v1841_v2 = vpop.f32.mrf.mxu2  ;;  %v5488_v3 = vpop.f32.mrf.mxu3 }
 0x1cf   : > { %v1854_v58 = vadd.f32 %v1841_v2, %v1787_v56  ;;  %v1588_v2 = vadd.f32 %v5464_v43, %v1521_v63  ;;  %v4923_v43 = vld [vmem:[%s6201_s5 + $0xb0] sm:$0xff] }
 0x1d0   : > { %v5493_v5 = vpop.f32.mrf.mxu0  ;;  %v5495_v6 = vpop.f32.mrf.mxu1  ;;  %2518 = vmatpush.bf16.msra.mxu1 %v4923_v43  ;;  %2464 = vmatpush.bf16.msra.mxu0 %v4918_v25 }
 0x1d1   : > { %v1921_v4 = vadd.f32 %v5488_v3, %v1854_v58  ;;  %v1788_v3 = vadd.f32 %v5477_v62, %v1721_v31  ;;  %v1655_v23 = vadd.f32 %v5466_v22, %v1588_v2  ;;  %v4922_v62 = vld [vmem:[%s6201_s5 + $0xa8] sm:$0xff] }
 0x1d3   : > { %v1722_v29 = vadd.f32 %v5493_v5, %v1655_v23  ;;  %v4927_v5 = vld [vmem:[%s6201_s5 + $0xd0] sm:$0xff] }
 0x1d4   : > { %2519 = vmatpush.bf16.msra.mxu1 %v4922_v62 }
 0x1d5   : > { %v1789_v27 = vadd.f32 %v5495_v6, %v1722_v29 }
 0x1d6   : > { %v5500_v8 = vpop.f32.mrf.mxu2  ;;  %v5502_v10 = vpop.f32.mrf.mxu3 }
 0x1d7   : > { %v1855_v14 = vadd.f32 %v5500_v8, %v1788_v3  ;;  %v4932_v8 = vld [vmem:[%s6201_s5 + $0xf8] sm:$0xff] }
 0x1d8   : > { %v5504_v11 = vpop.f32.mrf.mxu0  ;;  %v5506_v12 = vpop.f32.mrf.mxu1  ;;  %2627 = vmatpush.bf16.msra.mxu3 %v4932_v8 }
 0x1d9   : > { %v1922_v13 = vadd.f32 %v5502_v10, %v1855_v14  ;;  %v4931_v10 = vld [vmem:[%s6201_s5 + $0xf0] sm:$0xff]  ;;  %v1723_v6 = vadd.f32 %v5504_v11, %v5468_v53 }
 0x1db   : > { %v1790_v56 = vadd.f32 %v5506_v12, %v1723_v6 }
 0x1dc   : > { %2628 = vmatpush.bf16.msra.mxu3 %v4931_v10 }
 0x1de   : > { %v5511_v9 = vpop.f32.mrf.mxu2  ;;  %v5513_v19 = vpop.f32.mrf.mxu3 }
 0x1e0   : > { %v1717_v15 = vpop.f32.mrf.mxu0  ;;  %v1784_v28 = vpop.f32.mrf.mxu1  ;;  %2629 = vmatpush.bf16.msra.mxu3 %v4930_v49 }
 0x1e1   : > { %v4928_v28 = vld [vmem:[%s6201_s5 + $0xd8] sm:$0xff] }
 0x1e2   : > { %2572 = vmatpush.bf16.msra.mxu2 %v4928_v28 }
 0x1e4   : > { %2630 = vmatpush.bf16.msra.mxu3 %v4929_v30  ;;  %v4447_v30 = vld [vmem:[%s6203_s7 + $0xe0] sm:$0xf] }
 0x1e6   : > { %v5528_v35 = vpop.f32.mrf.mxu2  ;;  %v5530_v36 = vpop.f32.mrf.mxu3  ;;  %2573 = vmatpush.bf16.msra.mxu2 %v4927_v5 }
 0x1e7   : > { %v1857_v59 = vadd.f32 %v5528_v35, %v1790_v56 }
 0x1e8   : > { %v1970_v39 = vpop.f32.mrf.mxu0  ;;  %v2034_v24 = vpop.f32.mrf.mxu1 }
 0x1e9   : > { %v1984_v51 = vadd.f32 %v1970_v39, %v1920_v54  ;;  %v4917_v39 = vld [vmem:[%s6201_s5 + $0x80] sm:$0xff] }
 0x1ea   : > { %2465 = vmatpush.bf16.msra.mxu0 %v4917_v39  ;;  %2574 = vmatpush.bf16.msra.mxu2 %v4926_v46 }
 0x1eb   : > { %v2048_v0 = vadd.f32 %v2034_v24, %v1984_v51  ;;  %v4921_v24 = vld [vmem:[%s6201_s5 + $0xa0] sm:$0xff] }
 0x1ec   : > { %2520 = vmatpush.bf16.msra.mxu1 %v4921_v24 }
 0x1ee   : > { %v1851_v47 = vpop.f32.mrf.mxu2  ;;  %v1918_v48 = vpop.f32.mrf.mxu3 }
 0x1ef   : > { %v1856_v47 = vadd.f32 %v5511_v9, %v1789_v27  ;;  %v4925_v9 = vld [vmem:[%s6201_s5 + $0xc0] sm:$0xff] }
 0x1f0   : > { %v1972_v33 = vpop.f32.mrf.mxu0  ;;  %v2036_v52 = vpop.f32.mrf.mxu1  ;;  %2575 = vmatpush.bf16.msra.mxu2 %v4925_v9  ;;  %v4965_v9 = vld [vmem:[%s6203_s7 + $0xe4] sm:$0xf] }
 0x1f1   : > { %v1985_v20 = vadd.f32 %v1972_v33, %v1921_v4 }
 0x1f3   : > { %v2049_v26 = vadd.f32 %v2036_v52, %v1985_v20  ;;  %v1923_v52 = vadd.f32 %v5513_v19, %v1856_v47 }
 0x1f6   : > { %v2098_v57 = vpop.f32.mrf.mxu2  ;;  %v2165_v1 = vpop.f32.mrf.mxu3 }
 0x1f7   : > { %v2112_v7 = vadd.f32 %v2098_v57, %v2048_v0  ;;  %v4936_v0 = vld [vmem:[%s6201_s5 + $0x118] sm:$0xff] }
 0x1f8   : > { %v1975_v40 = vpop.f32.mrf.mxu0  ;;  %v2039_v61 = vpop.f32.mrf.mxu1 }
 0x1f9   : > { %v2179_v21 = vadd.f32 %v2165_v1, %v2112_v7  ;;  %v1986_v44 = vadd.f32 %v1975_v40, %v1922_v13  ;;  %v1924_v7 = vadd.f32 %v5530_v36, %v1857_v59  ;;  %v4935_v36 = vld [vmem:[%s6201_s5 + $0x110] sm:$0xff]  ;;  %v4933_v13 = vld [vmem:[%s6201_s5 + $0x100] sm:$0xff]  ;;  %v4457_v59 = vld [vmem:[%s6203_s7 + $0xf8] sm:$0xf0] }
 0x1fb   : > { %v2188_v15 = vadd.f32 %v5572_v17, %v2179_v21  ;;  %v2050_v54 = vadd.f32 %v2039_v61, %v1986_v44 }
 0x1fd   : > { %v2193_v22 = vmax.f32 %v2188_v15, 0.0 }
 0x1fe   : > { %v2100_v37 = vpop.f32.mrf.mxu2  ;;  %v2167_v38 = vpop.f32.mrf.mxu3 }
 0x1ff   : > { %2198 = vst.msk [vmem:[#allocation3] sm:$0xff] %vm532_vm3, %v2193_v22  ;;  %v2113_v16 = vadd.f32 %v2100_v37, %v2049_v26  ;;  %v4934_v22 = vld [vmem:[%s6201_s5 + $0x108] sm:$0xff] }
 0x200   : > { %v1977_v41 = vpop.f32.mrf.mxu0  ;;  %v2041_v42 = vpop.f32.mrf.mxu1 }
 0x201   : > { %v2180_v45 = vadd.f32 %v2167_v38, %v2113_v16  ;;  %v1987_v51 = vadd.f32 %v1977_v41, %v1923_v52  ;;  %v4449_v52 = vld [vmem:[%s6203_s7 + $0xf0] sm:$0xf0] }
 0x203   : > { %v2189_v48 = vadd.f32 %v5572_v17, %v2180_v45  ;;  %v2051_v19 = vadd.f32 %v2041_v42, %v1987_v51  ;;  %v4968_v51 = vld [vmem:[%s6203_s7 + $0xf4] sm:$0xf0] }
 0x205   : > { %v2194_v55 = vmax.f32 %v2189_v48, 0.0 }
 0x206   : > { %v2103_v32 = vpop.f32.mrf.mxu2  ;;  %v2170_v33 = vpop.f32.mrf.mxu3  ;;  %v2204_v31 = vld [vmem:[#allocation3] sm:$0xff] }
 0x207   : > { %2199 = vst.msk [vmem:[#allocation3 + $0x8] sm:$0xff] %vm532_vm3, %v2194_v55  ;;  %v2114_v50 = vadd.f32 %v2103_v32, %v2050_v54 }
 0x208   : > { %v1980_v53 = vpop.f32.mrf.mxu0  ;;  %v2044_v11 = vpop.f32.mrf.mxu1 }
 0x209   : > { %v2181_v58 = vadd.f32 %v2170_v33, %v2114_v50  ;;  %v1988_v21 = vadd.f32 %v1980_v53, %v1924_v7  ;;  %v4452_v50 = vor.u32 %v4965_v9, %v4449_v52  ;;  %v4967_v53 = vld [vmem:[%s6203_s7 + $0xec] sm:$0xf0]  ;;  %v4964_v7 = vld [vmem:[%s6203_s7 + $0xd4] sm:$0xf0] }
 0x20a   : > { %v4448_v56 = vor.u32 %v4967_v53, %v4447_v30  ;;  %v4525_v30 = vld [vmem:[%s6203_s7 + $0x78] sm:$0xf0] }
 0x20b   : > { %v2190_v60 = vadd.f32 %v5572_v17, %v2181_v58  ;;  %v2052_v15 = vadd.f32 %v2044_v11, %v1988_v21  ;;  %v4455_v11 = vld [vmem:[%s6203_s7 + $0xe8] sm:$0xf]  ;;  %v4966_v58 = vld [vmem:[%s6203_s7 + $0xec] sm:$0xf] }
 0x20d   : > { %v2195_v63 = vmax.f32 %v2190_v60, 0.0  ;;  %v4456_v60 = vor.u32 %v4968_v51, %v4455_v11  ;;  %v4945_v51 = vld [vmem:[%s6203_s7 + $0x44] sm:$0xf] }
 0x20e   : > { %v2105_v57 = vpop.f32.mrf.mxu2  ;;  %v2172_v1 = vpop.f32.mrf.mxu3  ;;  %v2215_v2 = vld [vmem:[#allocation3 + $0x1] sm:$0xff]  ;;  %v2216_v4 = vld [vmem:[#allocation3 + $0x9] sm:$0x1f] }
 0x20f   : > { %v2205_v12 = vld [vmem:[#allocation3 + $0x8] sm:$0x1f]  ;;  %2200 = vst.msk [vmem:[#allocation3 + $0x10] sm:$0xff] %vm532_vm3, %v2195_v63  ;;  %v2115_v35 = vadd.f32 %v2105_v57, %v2051_v19  ;;  %v2217_v34 = vpack.c.bf16 %v2216_v4, %v2215_v2  ;;  %v4460_v19 = vor.u32 %v4966_v58, %v4457_v59  ;;  %v4961_v63 = vld [vmem:[%s6203_s7 + $0xc4] sm:$0xf] }
 0x210   : > { %v2206_v40 = vpack.c.bf16 %v2205_v12, %v2204_v31  ;;  %v2309_v61 = vld [vmem:[#allocation3 + $0x2] sm:$0xff]  ;;  %v2310_v18 = vld [vmem:[#allocation3 + $0xa] sm:$0x1f]  ;;  %v1982_v43 = vpop.f32.mrf.mxu0  ;;  %v2046_v3 = vpop.f32.mrf.mxu1  ;;  %v4439_v12 = vld [vmem:[%s6203_s7 + $0xc8] sm:$0xf] }
 0x211   : > { %v2311_v20 = vpack.c.bf16 %v2310_v18, %v2309_v61  ;;  %v2182_v23 = vadd.f32 %v2172_v1, %v2115_v35  ;;  %4188 = vmatmul.msk.bf16.vlgmr.msrb.gmra.mxu0 %vm532_vm3, %v2217_v34  ;;  %v4433_v31 = vld [vmem:[%s6203_s7 + $0xd0] sm:$0xf0]  ;;  %v4963_v4 = vld [vmem:[%s6203_s7 + $0xcc] sm:$0xf0]  ;;  %v4440_v34 = vor.u32 %v4964_v7, %v4439_v12  ;;  %v4441_v61 = vld [vmem:[%s6203_s7 + $0xd8] sm:$0xf0] }
 0x212   : > { %4205 = vmatmul.msk.bf16.vlgmr.msrb.gmra.mxu1 %vm532_vm3, %v2206_v40  ;;  %2682 = vmatpush.bf16.msrb.mxu0 %v4936_v0  ;;  %v4431_v0 = vld [vmem:[%s6203_s7 + $0xc0] sm:$0xf]  ;;  %v4436_v2 = vor.u32 %v4961_v63, %v4433_v31  ;;  %v4962_v40 = vld [vmem:[%s6203_s7 + $0xcc] sm:$0xf]  ;;  %v4957_v43 = vld [vmem:[%s6203_s7 + $0xa4] sm:$0xf] }
 0x213   : > { %4230 = vmatmul.msk.bf16.vlgmr.msrb.gmra.mxu2 %vm532_vm3, %v2311_v20  ;;  %v2191_v14 = vadd.f32 %v5572_v17, %v2182_v23  ;;  %2830 = vmatpush.bf16.msrb.mxu1 %v4448_v56  ;;  %v4432_v35 = vor.u32 %v4963_v4, %v4431_v0  ;;  %v4444_v18 = vor.u32 %v4962_v40, %v4441_v61  ;;  %v4417_v3 = vld [vmem:[%s6203_s7 + $0xb0] sm:$0xf0]  ;;  %v4415_v20 = vld [vmem:[%s6203_s7 + $0xa0] sm:$0xf]  ;;  %v4947_v63 = vld [vmem:[%s6203_s7 + $0x4c] sm:$0xf0] }
 0x214   : > { %2843 = vmatpush.bf16.msrb.mxu2 %v4452_v50  ;;  %v4420_v23 = vor.u32 %v4957_v43, %v4417_v3  ;;  %v4950_v50 = vld [vmem:[%s6203_s7 + $0x6c] sm:$0xf]  ;;  %v4501_v58 = vld [vmem:[%s6203_s7 + $0x50] sm:$0xf0]  ;;  %v4499_v59 = vld [vmem:[%s6203_s7 + $0x40] sm:$0xf] }
 0x215   : > { %v2196_v28 = vmax.f32 %v2191_v14, 0.0  ;;  %v4423_v14 = vld [vmem:[%s6203_s7 + $0xa8] sm:$0xf]  ;;  %v4528_v56 = vor.u32 %v4950_v50, %v4525_v30  ;;  %v4948_v0 = vld [vmem:[%s6203_s7 + $0x54] sm:$0xf0] }
 0x216   : > { %v2108_v25 = vpop.f32.mrf.mxu2  ;;  %v2175_v62 = vpop.f32.mrf.mxu3  ;;  %v2364_v29 = vld [vmem:[#allocation3 + $0xb] sm:$0xff]  ;;  %v2365_v26 = vld [vmem:[#allocation3 + $0x13] sm:$0x1f]  ;;  %2683 = vmatpush.bf16.msrb.mxu0 %v4935_v36  ;;  %v4959_v36 = vld [vmem:[%s6203_s7 + $0xac] sm:$0xf0] }
 0x217   : > { %2201 = vst.msk [vmem:[#allocation3 + $0x18] sm:$0xff] %vm532_vm3, %v2196_v28  ;;  %v2116_v8 = vadd.f32 %v2108_v25, %v2052_v15  ;;  %v2366_v37 = vpack.c.bf16 %v2365_v26, %v2364_v29  ;;  %v2419_v39 = vld [vmem:[#allocation3 + $0xc] sm:$0xff]  ;;  %2831 = vmatpush.bf16.msrb.mxu1 %v4432_v35  ;;  %v4960_v15 = vld [vmem:[%s6203_s7 + $0xb4] sm:$0xf0]  ;;  %v4416_v28 = vor.u32 %v4959_v36, %v4415_v20  ;;  %v4507_v31 = vld [vmem:[%s6203_s7 + $0x48] sm:$0xf] }
 0x218   : > { %v2474_v10 = vld [vmem:[#allocation3 + $0xd] sm:$0xff]  ;;  %2844 = vmatpush.bf16.msrb.mxu2 %v4436_v2  ;;  %v4424_v25 = vor.u32 %v4960_v15, %v4423_v14  ;;  %v4500_v2 = vor.u32 %v4947_v63, %v4499_v59  ;;  %v4508_v4 = vor.u32 %v4948_v0, %v4507_v31  ;;  %v4946_v12 = vld [vmem:[%s6203_s7 + $0x4c] sm:$0xf]  ;;  %v4485_v40 = vld [vmem:[%s6203_s7 + $0x30] sm:$0xf0] }
 0x219   : > { %v2183_v38 = vadd.f32 %v2175_v62, %v2116_v8  ;;  %4255 = vmatmul.msk.bf16.vlgmr.msrb.gmra.mxu3 %vm532_vm3, %v2366_v37  ;;  %v4958_v62 = vld [vmem:[%s6203_s7 + $0xac] sm:$0xf]  ;;  %v4425_v29 = vld [vmem:[%s6203_s7 + $0xb8] sm:$0xf0]  ;;  %v4953_v8 = vld [vmem:[%s6203_s7 + $0x84] sm:$0xf] }
 0x21a   : > { %2684 = vmatpush.bf16.msrb.mxu0 %v4934_v22  ;;  %2856 = vmatpush.bf16.msrb.mxu3 %v4456_v60  ;;  %v4428_v22 = vor.u32 %v4958_v62, %v4425_v29  ;;  %v4401_v37 = vld [vmem:[%s6203_s7 + $0x90] sm:$0xf0]  ;;  %v4509_v7 = vld [vmem:[%s6203_s7 + $0x58] sm:$0xf0]  ;;  %v4941_v35 = vld [vmem:[%s6203_s7 + $0x24] sm:$0xf] }
 0x21b   : > { %v2192_v16 = vadd.f32 %v5572_v17, %v2183_v38  ;;  %2832 = vmatpush.bf16.msrb.mxu1 %v4416_v28  ;;  %v4399_v38 = vld [vmem:[%s6203_s7 + $0x80] sm:$0xf]  ;;  %v4488_v43 = vor.u32 %v4941_v35, %v4485_v40  ;;  %v4491_v20 = vld [vmem:[%s6203_s7 + $0x28] sm:$0xf]  ;;  %v4493_v28 = vld [vmem:[%s6203_s7 + $0x38] sm:$0xf0] }
 0x21c   : > { %2845 = vmatpush.bf16.msrb.mxu2 %v4420_v23  ;;  %v4483_v61 = vld [vmem:[%s6203_s7 + $0x20] sm:$0xf]  ;;  %v4942_v23 = vld [vmem:[%s6203_s7 + $0x2c] sm:$0xf]  ;;  %v4469_v62 = vld [vmem:[%s6203_s7 + $0x10] sm:$0xf0] }
 0x21d   : > { %v2197_v5 = vmax.f32 %v2192_v16, 0.0  ;;  %v4404_v16 = vor.u32 %v4953_v8, %v4401_v37  ;;  %v4475_v8 = vld [vmem:[%s6203_s7 + $0x8] sm:$0xf]  ;;  %v4981_v50 = vld [vmem:[%s6203_s7 + $0x164] sm:$0xf] }
 0x21e   : > { %v2110_v24 = vpop.f32.mrf.mxu2  ;;  %v2177_v41 = vpop.f32.mrf.mxu3  ;;  %v2420_v42 = vld [vmem:[#allocation3 + $0x14] sm:$0x1f]  ;;  %2685 = vmatpush.bf16.msrb.mxu0 %v4933_v13  ;;  %2857 = vmatpush.bf16.msrb.mxu3 %v4440_v34  ;;  %v4512_v34 = vor.u32 %v4946_v12, %v4509_v7  ;;  %v4601_v30 = vld [vmem:[%s6203_s7 + $0x170] sm:$0xf0]  ;;  %v4982_v59 = vld [vmem:[%s6203_s7 + $0x16c] sm:$0xf] }
 0x21f   : > { %v2475_v27 = vld [vmem:[#allocation3 + $0x15] sm:$0x1f]  ;;  %2203 = vst.msk [vmem:[#allocation3 + $0x20] sm:$0x1f] %vm2202_vm6, %v2197_v5  ;;  %v2421_v44 = vpack.c.bf16 %v2420_v42, %v2419_v39  ;;  %v4955_v5 = vld [vmem:[%s6203_s7 + $0x8c] sm:$0xf0]  ;;  %v4604_v0 = vor.u32 %v4981_v50, %v4601_v30 }
 0x220   : > { %v2476_v45 = vpack.c.bf16 %v2475_v27, %v2474_v10  ;;  %v2529_v46 = vld [vmem:[#allocation3 + $0x16] sm:$0xff]  ;;  %v4956_v24 = vld [vmem:[%s6203_s7 + $0x94] sm:$0xf0]  ;;  %v4400_v42 = vor.u32 %v4955_v5, %v4399_v38  ;;  %2846 = vmatpush.bf16.msrb.mxu2 %v4404_v16  ;;  %v4583_v35 = vld [vmem:[%s6203_s7 + $0x140] sm:$0xf] }
 0x221   : > { %4280 = vmatmul.msk.bf16.vlgmr.msra.gmra.mxu0 %vm532_vm3, %v2421_v44  ;;  %v2584_v48 = vld [vmem:[#allocation3 + $0x17] sm:$0xff]  ;;  %v4409_v44 = vld [vmem:[%s6203_s7 + $0x98] sm:$0xf0]  ;;  %v4940_v16 = vld [vmem:[%s6203_s7 + $0x14] sm:$0xf0] }
 0x222   : > { %4305 = vmatmul.msk.bf16.vlgmr.msra.gmra.mxu1 %vm532_vm3, %v2476_v45  ;;  %v2639_v55 = vld [vmem:[#allocation3 + $0x18] sm:$0xff]  ;;  %2869 = vmatpush.bf16.msra.mxu0 %v4460_v19  ;;  %v4504_v19 = vor.u32 %v4945_v51, %v4501_v58  ;;  %v4984_v58 = vld [vmem:[%s6203_s7 + $0x174] sm:$0xf0]  ;;  %v4693_v50 = vld [vmem:[%s6203_s7 + $0x1f8] sm:$0xf0] }
 0x223   : > { %2858 = vmatpush.bf16.msrb.mxu3 %v4424_v25  ;;  %v4407_v39 = vld [vmem:[%s6203_s7 + $0x88] sm:$0xf]  ;;  %v4954_v27 = vld [vmem:[%s6203_s7 + $0x8c] sm:$0xf]  ;;  %2833 = vmatpush.bf16.msrb.mxu1 %v4400_v42  ;;  %v4937_v25 = vld [vmem:[%s6203_s7 + $0x4] sm:$0xf]  ;;  %v4476_v42 = vor.u32 %v4940_v16, %v4475_v8 }
 0x224   : > { %v4408_v10 = vor.u32 %v4956_v24, %v4407_v39  ;;  %v4938_v5 = vld [vmem:[%s6203_s7 + $0xc] sm:$0xf]  ;;  %v4477_v39 = vld [vmem:[%s6203_s7 + $0x18] sm:$0xf0]  ;;  %v4591_v40 = vld [vmem:[%s6203_s7 + $0x148] sm:$0xf] }
 0x225   : > { %v4553_v16 = vld [vmem:[%s6203_s7 + $0x110] sm:$0xf0] }
 0x226   : > { %v2530_v47 = vld [vmem:[#allocation3 + $0x1e] sm:$0x1f]  ;;  %2870 = vmatpush.bf16.msra.mxu0 %v4444_v18 }
 0x227   : > { %v2585_v17 = vld [vmem:[#allocation3 + $0x1f] sm:$0x1f]  ;;  %v2531_v49 = vpack.c.bf16 %v2530_v47, %v2529_v46  ;;  %v4412_v46 = vor.u32 %v4954_v27, %v4409_v44  ;;  %2859 = vmatpush.bf16.msrb.mxu3 %v4408_v10  ;;  %v4480_v27 = vor.u32 %v4938_v5, %v4477_v39 }
 0x228   : > { %v2586_v6 = vpack.c.bf16 %v2585_v17, %v2584_v48  ;;  %v2640_v54 = vld [vmem:[#allocation3 + $0x20] sm:$0x1f]  ;;  %v4949_v48 = vld [vmem:[%s6203_s7 + $0x64] sm:$0xf] }
 0x229   : > { %4330 = vmatmul.msk.bf16.vlgmr.msra.gmra.mxu2 %vm532_vm3, %v2531_v49  ;;  %v2641_v32 = vpack.c.bf16 %v2640_v54, %v2639_v55  ;;  %v4517_v17 = vld [vmem:[%s6203_s7 + $0x70] sm:$0xf0]  ;;  %v4515_v49 = vld [vmem:[%s6203_s7 + $0x60] sm:$0xf]  ;;  %v4951_v54 = vld [vmem:[%s6203_s7 + $0x6c] sm:$0xf0] }
 0x22a   : > { %4355 = vmatmul.msk.bf16.vlgmr.msra.gmra.mxu3 %vm532_vm3, %v2586_v6  ;;  %2871 = vmatpush.bf16.msra.mxu0 %v4428_v22  ;;  %v4520_v6 = vor.u32 %v4949_v48, %v4517_v17  ;;  %v4523_v55 = vld [vmem:[%s6203_s7 + $0x68] sm:$0xf]  ;;  %v4516_v9 = vor.u32 %v4951_v54, %v4515_v49  ;;  %v4943_v18 = vld [vmem:[%s6203_s7 + $0x2c] sm:$0xf0] }
 0x22b   : > { %v4484_v3 = vor.u32 %v4943_v18, %v4483_v61  ;;  %v4939_v22 = vld [vmem:[%s6203_s7 + $0xc] sm:$0xf0]  ;;  %v4980_v61 = vld [vmem:[%s6203_s7 + $0x154] sm:$0xf0]  ;;  %v4978_v18 = vld [vmem:[%s6203_s7 + $0x14c] sm:$0xf] }
 0x22c   : > { %2978 = vmatpush.bf16.msra.mxu2 %v4520_v6  ;;  %2965 = vmatpush.bf16.msra.mxu1 %v4516_v9 }
 0x22e   : > { %2872 = vmatpush.bf16.msra.mxu0 %v4412_v46  ;;  %v5043_v46 = vld [vmem:[%s6202_s6] ss:$0 sm:$0xff] }
 0x230   : > { %2979 = vmatpush.bf16.msra.mxu2 %v4504_v19  ;;  %2966 = vmatpush.bf16.msra.mxu1 %v4500_v2  ;;  %v4977_v2 = vld [vmem:[%s6203_s7 + $0x144] sm:$0xf] }
 0x231   : > { %4380 = vmatmul.msk.bf16.vlgmr.msrb.gmra.mxu0 %vm532_vm3, %v2641_v32  ;;  %v4952_v32 = vld [vmem:[%s6203_s7 + $0x74] sm:$0xf0] }
 0x232   : > { %v4524_v52 = vor.u32 %v4952_v32, %v4523_v55  ;;  %3004 = vmatpush.bf16.msrb.mxu0 %v4528_v56  ;;  %v4607_v56 = vld [vmem:[%s6203_s7 + $0x168] sm:$0xf] }
 0x233   : > { %v4608_v12 = vor.u32 %v4984_v58, %v4607_v56  ;;  %v4993_v56 = vld [vmem:[%s6203_s7 + $0x1c4] sm:$0xf] }
 0x234   : > { %2991 = vmatpush.bf16.msra.mxu3 %v4524_v52  ;;  %2980 = vmatpush.bf16.msra.mxu2 %v4488_v43  ;;  %v4593_v43 = vld [vmem:[%s6203_s7 + $0x158] sm:$0xf0] }
 0x235   : > { %2967 = vmatpush.bf16.msra.mxu1 %v4484_v3 }
 0x236   : > { %3005 = vmatpush.bf16.msrb.mxu0 %v4512_v34  ;;  %v4979_v34 = vld [vmem:[%s6203_s7 + $0x14c] sm:$0xf0] }
 0x238   : > { %2992 = vmatpush.bf16.msra.mxu3 %v4508_v4  ;;  %v4585_v4 = vld [vmem:[%s6203_s7 + $0x150] sm:$0xf0] }
 0x28e   : > { %v2263_v33 = vpop.f32.mrf.mxu0 }
 0x28f   : > { %v2304_v57 = vpop.f32.mrf.mxu1 }
 0x290   : > { %v2305_v41 = vadd.f32 %v2304_v57, %v2263_v33 }
 0x296   : > { %v5695_v1 = vpop.f32.mrf.mxu0  ;;  %v2357_v21 = vpop.f32.mrf.mxu2 }
 0x297   : > { %v2306_v45 = vpop.f32.mrf.mxu1  ;;  %v2362_v47 = vadd.f32 %v2357_v21, %v2305_v41  ;;  %v4944_v21 = vld [vmem:[%s6203_s7 + $0x34] sm:$0xf0] }
 0x298   : > { %v2307_v36 = vadd.f32 %v2306_v45, %v5695_v1  ;;  %v4492_v15 = vor.u32 %v4944_v21, %v4491_v20  ;;  %v4467_v1 = vld [vmem:[%s6203_s7] sm:$0xf]  ;;  %v4588_v21 = vor.u32 %v4977_v2, %v4585_v4 }
 0x299   : > { %v4468_v41 = vor.u32 %v4939_v22, %v4467_v1  ;;  %v4974_v1 = vld [vmem:[%s6203_s7 + $0x12c] sm:$0xf]  ;;  %v4577_v22 = vld [vmem:[%s6203_s7 + $0x138] sm:$0xf0] }
 0x29a   : > { %2993 = vmatpush.bf16.msra.mxu3 %v4492_v15  ;;  %v4592_v15 = vor.u32 %v4980_v61, %v4591_v40  ;;  %v4580_v39 = vor.u32 %v4974_v1, %v4577_v22  ;;  %v4991_v61 = vld [vmem:[%s6203_s7 + $0x1ac] sm:$0xf0]  ;;  %v4988_v1 = vld [vmem:[%s6203_s7 + $0x194] sm:$0xf0]  ;;  %v4986_v22 = vld [vmem:[%s6203_s7 + $0x18c] sm:$0xf] }
 0x29b   : > { %2968 = vmatpush.bf16.msra.mxu1 %v4468_v41  ;;  %v4971_v41 = vld [vmem:[%s6203_s7 + $0x10c] sm:$0xf0] }
 0x29c   : > { %v2412_v26 = vpop.f32.mrf.mxu3 }
 0x29d   : > { %v2417_v33 = vadd.f32 %v2412_v26, %v2362_v47  ;;  %v4496_v26 = vor.u32 %v4942_v23, %v4493_v28  ;;  %v4584_v23 = vor.u32 %v4979_v34, %v4583_v35  ;;  %v4596_v28 = vor.u32 %v4978_v18, %v4593_v43  ;;  %v4653_v35 = vld [vmem:[%s6203_s7 + $0x1b0] sm:$0xf0]  ;;  %v4659_v18 = vld [vmem:[%s6203_s7 + $0x1a8] sm:$0xf]  ;;  %v4992_v43 = vld [vmem:[%s6203_s7 + $0x1b4] sm:$0xf0] }
 0x29e   : > { %v2467_v13 = vpop.f32.mrf.mxu0  ;;  %v2359_v53 = vpop.f32.mrf.mxu2  ;;  %2994 = vmatpush.bf16.msra.mxu3 %v4476_v42  ;;  %v4559_v42 = vld [vmem:[%s6203_s7 + $0x108] sm:$0xf] }
 0x29f   : > { %v2472_v57 = vadd.f32 %v2467_v13, %v2417_v33  ;;  %v2522_v14 = vpop.f32.mrf.mxu1  ;;  %v2363_v37 = vadd.f32 %v2359_v53, %v2307_v36  ;;  %v4472_v13 = vor.u32 %v4937_v25, %v4469_v62  ;;  %3006 = vmatpush.bf16.msrb.mxu0 %v4496_v26  ;;  %v4599_v53 = vld [vmem:[%s6203_s7 + $0x160] sm:$0xf]  ;;  %v4973_v36 = vld [vmem:[%s6203_s7 + $0x124] sm:$0xf]  ;;  %v4975_v62 = vld [vmem:[%s6203_s7 + $0x12c] sm:$0xf0] }
 0x2a0   : > { %v4567_v25 = vld [vmem:[%s6203_s7 + $0x120] sm:$0xf]  ;;  %v4976_v26 = vld [vmem:[%s6203_s7 + $0x134] sm:$0xf0] }
 0x2a1   : > { %v2527_v29 = vadd.f32 %v2522_v14, %v2472_v57  ;;  %2981 = vmatpush.bf16.msra.mxu2 %v4472_v13  ;;  %v4569_v14 = vld [vmem:[%s6203_s7 + $0x130] sm:$0xf0]  ;;  %v4969_v13 = vld [vmem:[%s6203_s7 + $0x104] sm:$0xf] }
 0x2a3   : > { %3007 = vmatpush.bf16.msrb.mxu0 %v4480_v27  ;;  %v4970_v27 = vld [vmem:[%s6203_s7 + $0x10c] sm:$0xf] }
 0x2a4   : > { %v2414_v11 = vpop.f32.mrf.mxu3 }
 0x2a5   : > { %v2418_v44 = vadd.f32 %v2414_v11, %v2363_v37  ;;  %v4983_v11 = vld [vmem:[%s6203_s7 + $0x16c] sm:$0xf0]  ;;  %v4572_v37 = vor.u32 %v4973_v36, %v4569_v14  ;;  %v4985_v14 = vld [vmem:[%s6203_s7 + $0x184] sm:$0xf] }
 0x2a6   : > { %v2469_v60 = vpop.f32.mrf.mxu0  ;;  %v4600_v57 = vor.u32 %v4983_v11, %v4599_v53 }
 0x2a7   : > { %v2473_v17 = vadd.f32 %v2469_v60, %v2418_v44  ;;  %v2524_v54 = vpop.f32.mrf.mxu1  ;;  %v4609_v60 = vld [vmem:[%s6203_s7 + $0x178] sm:$0xf0] }
 0x2a8   : > { %v4612_v7 = vor.u32 %v4982_v59, %v4609_v60  ;;  %v4561_v44 = vld [vmem:[%s6203_s7 + $0x118] sm:$0xf0]  ;;  %v4667_v60 = vld [vmem:[%s6203_s7 + $0x1c0] sm:$0xf] }
 0x2a9   : > { %v2528_v32 = vadd.f32 %v2524_v54, %v2473_v17  ;;  %v4685_v17 = vld [vmem:[%s6203_s7 + $0x1f0] sm:$0xf0]  ;;  %v4683_v54 = vld [vmem:[%s6203_s7 + $0x1e0] sm:$0xf] }
 0x2ac   : > { %v2577_v38 = vpop.f32.mrf.mxu2 }
 0x2ad   : > { %v2582_v24 = vadd.f32 %v2577_v38, %v2527_v29  ;;  %v2632_v10 = vpop.f32.mrf.mxu3  ;;  %v4575_v29 = vld [vmem:[%s6203_s7 + $0x128] sm:$0xf]  ;;  %v4568_v38 = vor.u32 %v4975_v62, %v4567_v25  ;;  %v4635_v62 = vld [vmem:[%s6203_s7 + $0x180] sm:$0xf] }
 0x2ae   : > { %v2687_v47 = vpop.f32.mrf.mxu0  ;;  %v4576_v5 = vor.u32 %v4976_v26, %v4575_v29  ;;  %v4987_v29 = vld [vmem:[%s6203_s7 + $0x18c] sm:$0xf0]  ;;  %v4643_v26 = vld [vmem:[%s6203_s7 + $0x188] sm:$0xf] }
 0x2af   : > { %v2637_v45 = vadd.f32 %v2632_v10, %v2582_v24  ;;  %v4551_v24 = vld [vmem:[%s6203_s7 + $0x100] sm:$0xf]  ;;  %v4972_v10 = vld [vmem:[%s6203_s7 + $0x114] sm:$0xf0] }
 0x2b1   : > { %v2692_v48 = vadd.f32 %v2687_v47, %v2637_v45  ;;  %v4552_v47 = vor.u32 %v4971_v41, %v4551_v24  ;;  %v5008_v41 = vld [vmem:[%s6205_s9 + $0x38] sm:$0xff] }
 0x2b3   : > { %v2698_v49 = vadd.f32 %v5043_v46, %v2692_v48  ;;  %v4997_v48 = vld [vmem:[%s6203_s7 + $0x1e4] sm:$0xf] }
 0x2b4   : > { %v2579_v55 = vpop.f32.mrf.mxu2  ;;  %v4688_v53 = vor.u32 %v4997_v48, %v4685_v17  ;;  %v5006_v48 = vld [vmem:[%s6205_s9 + $0x28] sm:$0xff] }
 0x2b5   : > { %v2700_v6 = vmax.f32 %v2698_v49, 0.0  ;;  %v2583_v52 = vadd.f32 %v2579_v55, %v2528_v32  ;;  %v2634_v19 = vpop.f32.mrf.mxu3  ;;  %v4560_v49 = vor.u32 %v4972_v10, %v4559_v42  ;;  %v4999_v55 = vld [vmem:[%s6203_s7 + $0x1ec] sm:$0xf0]  ;;  %v4691_v32 = vld [vmem:[%s6203_s7 + $0x1e8] sm:$0xf]  ;;  %v5032_v42 = vld [vmem:[%s6205_s9 + $0xf8] sm:$0xff] }
 0x2b6   : > { %v2689_v3 = vpop.f32.mrf.mxu0  ;;  %v4684_v11 = vor.u32 %v4999_v55, %v4683_v54  ;;  %v5007_v10 = vld [vmem:[%s6205_s9 + $0x30] sm:$0xff]  ;;  %v5030_v17 = vld [vmem:[%s6205_s9 + $0xe8] sm:$0xff] }
 0x2b7   : > { %v5860_v33 = vpack.c.bf16 %v2700_v6, %v2700_v6  ;;  %v2638_v31 = vadd.f32 %v2634_v19, %v2583_v52  ;;  %v4564_v6 = vor.u32 %v4970_v27, %v4561_v44  ;;  %v4998_v52 = vld [vmem:[%s6203_s7 + $0x1ec] sm:$0xf]  ;;  %v4995_v19 = vld [vmem:[%s6203_s7 + $0x1cc] sm:$0xf0] }
 0x2b8   : > { %v4696_v59 = vor.u32 %v4998_v52, %v4693_v50  ;;  %v5031_v27 = vld [vmem:[%s6205_s9 + $0xf0] sm:$0xff]  ;;  %v5029_v52 = vld [vmem:[%s6205_s9 + $0xe0] sm:$0xff] }
 0x2b9   : > { %v2738_v9 = vunpack.c.l.b16 %v5860_v33  ;;  %v2693_v20 = vadd.f32 %v2689_v3, %v2638_v31  ;;  %v4996_v31 = vld [vmem:[%s6203_s7 + $0x1d4] sm:$0xf0]  ;;  %v4990_v3 = vld [vmem:[%s6203_s7 + $0x1ac] sm:$0xf] }
 0x2bb   : > { %v2739_v51 = vpack.c.b16 %v2738_v9, %v2738_v9  ;;  %v2699_v8 = vadd.f32 %v5043_v46, %v2693_v20  ;;  %v4556_v46 = vor.u32 %v4969_v13, %v4553_v16  ;;  %v5000_v9 = vld [vmem:[%s6203_s7 + $0x1f4] sm:$0xf0]  ;;  %v4661_v20 = vld [vmem:[%s6203_s7 + $0x1b8] sm:$0xf0]  ;;  %v4636_v13 = vor.u32 %v4987_v29, %v4635_v62 }
 0x2bc   : > { %v4692_v58 = vor.u32 %v5000_v9, %v4691_v32  ;;  %v4664_v25 = vor.u32 %v4990_v3, %v4661_v20  ;;  %v4644_v16 = vor.u32 %v4988_v1, %v4643_v26  ;;  %v5005_v9 = vld [vmem:[%s6205_s9 + $0x20] sm:$0xff]  ;;  %v5010_v3 = vld [vmem:[%s6205_s9 + $0x48] sm:$0xff] }
 0x2bd   : > { %v2741_v63 = vshrl.u32 %v2739_v51, 16  ;;  %v2701_v45 = vmax.f32 %v2699_v8, 0.0  ;;  %v4669_v51 = vld [vmem:[%s6203_s7 + $0x1d0] sm:$0xf0]  ;;  %v4645_v8 = vld [vmem:[%s6203_s7 + $0x198] sm:$0xf0] }
 0x2be   : > { %v4672_v4 = vor.u32 %v4993_v56, %v4669_v51  ;;  %v5028_v56 = vld [vmem:[%s6205_s9 + $0xd8] sm:$0xff]  ;;  %v5013_v51 = vld [vmem:[%s6205_s9 + $0x60] sm:$0xff]  ;;  %v5018_v20 = vld [vmem:[%s6205_s9 + $0x88] sm:$0xff] }
 0x2bf   : > { %4461 = vmatmul.msk.bf16.vlgmr.msrb.gmra.mxu1 %vm532_vm3, %v2741_v63  ;;  %4462 = vmatmul.msk.bf16.vlgmr.msrb.gmra.mxu2 %vm532_vm3, %v2741_v63  ;;  %v2703_v30 = vpack.c.bf16 %v2701_v45, %v2701_v45  ;;  %v3333_v1 = vld [vmem:[%s6204_s8] sm:$0xf] }
 0x2c0   : > { %4463 = vmatmul.msk.bf16.vlgmr.msrb.gmra.mxu3 %vm532_vm3, %v2741_v63  ;;  %4464 = vmatmul.msk.bf16.vlgmr.msra.gmra.mxu0 %vm532_vm3, %v2741_v63  ;;  %v4675_v63 = vld [vmem:[%s6203_s7 + $0x1c8] sm:$0xf] }
 0x2c1   : > { %3137 = vmatpush.bf16.msrb.mxu2 %v4604_v0  ;;  %3124 = vmatpush.bf16.msrb.mxu1 %v4600_v57  ;;  %v4994_v0 = vld [vmem:[%s6203_s7 + $0x1cc] sm:$0xf]  ;;  %v4677_v57 = vld [vmem:[%s6203_s7 + $0x1d8] sm:$0xf0]  ;;  %v3031_v2 = vunpack.c.l.b16 %v2703_v30  ;;  %v4676_v34 = vor.u32 %v4996_v31, %v4675_v63  ;;  %v5027_v63 = vld [vmem:[%s6205_s9 + $0xd0] sm:$0xff] }
 0x2c2   : > { %3150 = vmatpush.bf16.msrb.mxu3 %v4608_v12  ;;  %3163 = vmatpush.bf16.msra.mxu0 %v4612_v7  ;;  %v4668_v12 = vor.u32 %v4995_v19, %v4667_v60  ;;  %v4989_v7 = vld [vmem:[%s6203_s7 + $0x1a4] sm:$0xf]  ;;  %v4680_v40 = vor.u32 %v4994_v0, %v4677_v57  ;;  %v5014_v30 = vld [vmem:[%s6205_s9 + $0x68] sm:$0xff]  ;;  %v5003_v19 = vld [vmem:[%s6205_s9 + $0x10] sm:$0xff] }
 0x2c3   : > { %v5012_v57 = vld [vmem:[%s6205_s9 + $0x58] sm:$0xff] }
 0x2c5   : > { %3138 = vmatpush.bf16.msrb.mxu2 %v4588_v21  ;;  %3125 = vmatpush.bf16.msrb.mxu1 %v4584_v23  ;;  %v3032_v21 = vpack.c.b16 %v3031_v2, %v3031_v2  ;;  %v4656_v23 = vor.u32 %v4989_v7, %v4653_v35  ;;  %v5020_v2 = vld [vmem:[%s6205_s9 + $0x98] sm:$0xff]  ;;  %v5011_v35 = vld [vmem:[%s6205_s9 + $0x50] sm:$0xff] }
 0x2c6   : > { %3151 = vmatpush.bf16.msrb.mxu3 %v4592_v15  ;;  %3164 = vmatpush.bf16.msra.mxu0 %v4596_v28  ;;  %v4637_v15 = vld [vmem:[%s6203_s7 + $0x190] sm:$0xf0]  ;;  %v4660_v28 = vor.u32 %v4992_v43, %v4659_v18  ;;  %v5025_v18 = vld [vmem:[%s6205_s9 + $0xc0] sm:$0xff] }
 0x2c7   : > { %v3193_v24 = vrot.slane %v3032_v21, 2 }
 0x2c9   : > { %3139 = vmatpush.bf16.msrb.mxu2 %v4572_v37  ;;  %3126 = vmatpush.bf16.msrb.mxu1 %v4568_v38  ;;  %v3034_v37 = vshrl.u32 %v3032_v21, 16  ;;  %v4640_v38 = vor.u32 %v4985_v14, %v4637_v15 }
 0x2ca   : > { %3152 = vmatpush.bf16.msrb.mxu3 %v4576_v5  ;;  %3165 = vmatpush.bf16.msra.mxu0 %v4580_v39  ;;  %v4648_v5 = vor.u32 %v4986_v22, %v4645_v8 }
 0x2cb   : > { %v3036_v39 = vrot.slane %v3034_v37, 1 }
 0x2cd   : > { %3140 = vmatpush.bf16.msrb.mxu2 %v4556_v46  ;;  %3127 = vmatpush.bf16.msrb.mxu1 %v4552_v47  ;;  %v5016_v46 = vld [vmem:[%s6205_s9 + $0x78] sm:$0xff] }
 0x2ce   : > { %3153 = vmatpush.bf16.msrb.mxu3 %v4560_v49  ;;  %3166 = vmatpush.bf16.msra.mxu0 %v4564_v6  ;;  %v5024_v47 = vld [vmem:[%s6205_s9 + $0xb8] sm:$0xff]  ;;  %v5015_v49 = vld [vmem:[%s6205_s9 + $0x70] sm:$0xff] }
 0x2cf   : > { %4529 = vmatmul.msk.bf16.vlgmr.msra.gmra.mxu1 %vm532_vm3, %v5860_v33  ;;  %4530 = vmatmul.msk.bf16.vlgmr.msra.gmra.mxu2 %vm532_vm3, %v5860_v33  ;;  %v5023_v6 = vld [vmem:[%s6205_s9 + $0xb0] sm:$0xff] }
 0x2d0   : > { %4531 = vmatmul.msk.bf16.vlgmr.msra.gmra.mxu3 %vm532_vm3, %v5860_v33  ;;  %4532 = vmatmul.msk.bf16.vlgmr.msrb.gmra.mxu0 %vm532_vm3, %v5860_v33  ;;  %v4651_v33 = vld [vmem:[%s6203_s7 + $0x1a0] sm:$0xf] }
 0x2d1   : > { %3294 = vmatpush.bf16.msra.mxu2 %v4688_v53  ;;  %3281 = vmatpush.bf16.msra.mxu1 %v4684_v11  ;;  %v4652_v36 = vor.u32 %v4991_v61, %v4651_v33  ;;  %v5022_v53 = vld [vmem:[%s6205_s9 + $0xa8] sm:$0xff]  ;;  %v5004_v11 = vld [vmem:[%s6205_s9 + $0x18] sm:$0xff]  ;;  %v5001_v61 = vld [vmem:[%s6205_s9] sm:$0xff] }
 0x2d2   : > { %3307 = vmatpush.bf16.msra.mxu3 %v4692_v58  ;;  %3320 = vmatpush.bf16.msrb.mxu0 %v4696_v59  ;;  %v5021_v58 = vld [vmem:[%s6205_s9 + $0xa0] sm:$0xff] }
 0x2d5   : > { %3295 = vmatpush.bf16.msra.mxu2 %v4672_v4  ;;  %3282 = vmatpush.bf16.msra.mxu1 %v4668_v12  ;;  %v5002_v4 = vld [vmem:[%s6205_s9 + $0x8] sm:$0xff] }
 0x2d6   : > { %3308 = vmatpush.bf16.msra.mxu3 %v4676_v34  ;;  %3321 = vmatpush.bf16.msrb.mxu0 %v4680_v40  ;;  %v5026_v12 = vld [vmem:[%s6205_s9 + $0xc8] sm:$0xff]  ;;  %v5019_v34 = vld [vmem:[%s6205_s9 + $0x90] sm:$0xff] }
 0x2d9   : > { %3296 = vmatpush.bf16.msra.mxu2 %v4656_v23  ;;  %3283 = vmatpush.bf16.msra.mxu1 %v4652_v36  ;;  %v5009_v23 = vld [vmem:[%s6205_s9 + $0x40] sm:$0xff] }
 0x2da   : > { %3309 = vmatpush.bf16.msra.mxu3 %v4660_v28  ;;  %3322 = vmatpush.bf16.msrb.mxu0 %v4664_v25  ;;  %v5017_v36 = vld [vmem:[%s6205_s9 + $0x80] sm:$0xff] }
 0x2dd   : > { %3297 = vmatpush.bf16.msra.mxu2 %v4640_v38  ;;  %3284 = vmatpush.bf16.msra.mxu1 %v4636_v13 }
 0x2de   : > { %3310 = vmatpush.bf16.msra.mxu3 %v4644_v16  ;;  %3323 = vmatpush.bf16.msrb.mxu0 %v4648_v5  ;;  %v3335_v16 = vperm.slane %v3333_v1, 0 }
 0x2df   : > { %4613 = vmatmul.msk.bf16.vlgmr.msrb.gmra.mxu1 %vm532_vm3, %v3036_v39  ;;  %4614 = vmatmul.msk.bf16.vlgmr.msrb.gmra.mxu2 %vm532_vm3, %v3036_v39 }
 0x2e0   : > { %4615 = vmatmul.msk.bf16.vlgmr.msrb.gmra.mxu3 %vm532_vm3, %v3036_v39  ;;  %4616 = vmatmul.msk.bf16.vlgmr.msra.gmra.mxu0 %vm532_vm3, %v3036_v39 }
 0x2e1   : > { %3612 = vmatpush.bf16.msrb.mxu1 %v5008_v41  ;;  %3625 = vmatpush.bf16.msrb.mxu2 %v5016_v46 }
 0x2e2   : > { %3651 = vmatpush.bf16.msra.mxu0 %v5032_v42  ;;  %3638 = vmatpush.bf16.msrb.mxu3 %v5024_v47 }
 0x2e5   : > { %3613 = vmatpush.bf16.msrb.mxu1 %v5007_v10  ;;  %3626 = vmatpush.bf16.msrb.mxu2 %v5015_v49  ;;  %v3336_v49 = vperm.slane %v3333_v1, 1 }
 0x2e6   : > { %3652 = vmatpush.bf16.msra.mxu0 %v5031_v27  ;;  %3639 = vmatpush.bf16.msrb.mxu3 %v5023_v6 }
 0x2e9   : > { %3614 = vmatpush.bf16.msrb.mxu1 %v5006_v48  ;;  %3627 = vmatpush.bf16.msrb.mxu2 %v5014_v30 }
 0x2ea   : > { %3653 = vmatpush.bf16.msra.mxu0 %v5030_v17  ;;  %3640 = vmatpush.bf16.msrb.mxu3 %v5022_v53 }
 0x2ed   : > { %3615 = vmatpush.bf16.msrb.mxu1 %v5005_v9  ;;  %3628 = vmatpush.bf16.msrb.mxu2 %v5013_v51  ;;  %v3337_v9 = vperm.slane %v3333_v1, 2 }
 0x2ee   : > { %3654 = vmatpush.bf16.msra.mxu0 %v5029_v52  ;;  %3641 = vmatpush.bf16.msrb.mxu3 %v5021_v58 }
 0x2ef   : > { %4697 = vmatmul.msk.bf16.vlgmr.msra.gmra.mxu1 %vm532_vm3, %v3193_v24  ;;  %4698 = vmatmul.msk.bf16.vlgmr.msra.gmra.mxu2 %vm532_vm3, %v3193_v24 }
 0x2f0   : > { %4699 = vmatmul.msk.bf16.vlgmr.msra.gmra.mxu3 %vm532_vm3, %v3193_v24  ;;  %4700 = vmatmul.msk.bf16.vlgmr.msrb.gmra.mxu0 %vm532_vm3, %v3193_v24  ;;  %v3338_v24 = vperm.slane %v3333_v1, 3 }
 0x2f1   : > { %3616 = vmatpush.bf16.msrb.mxu1 %v5004_v11  ;;  %3629 = vmatpush.bf16.msrb.mxu2 %v5012_v57 }
 0x2f2   : > { %3655 = vmatpush.bf16.msra.mxu0 %v5028_v56  ;;  %3642 = vmatpush.bf16.msrb.mxu3 %v5020_v2  ;;  %v3419_v2 = vld [vmem:[%s6206_s10] sm:$0x1] }
 0x2f5   : > { %3617 = vmatpush.bf16.msrb.mxu1 %v5003_v19  ;;  %3630 = vmatpush.bf16.msrb.mxu2 %v5011_v35 }
 0x2f6   : > { %3656 = vmatpush.bf16.msra.mxu0 %v5027_v63  ;;  %3643 = vmatpush.bf16.msrb.mxu3 %v5019_v34 }
 0x2f9   : > { %3618 = vmatpush.bf16.msrb.mxu1 %v5002_v4  ;;  %3631 = vmatpush.bf16.msrb.mxu2 %v5010_v3 }
 0x2fa   : > { %3657 = vmatpush.bf16.msra.mxu0 %v5026_v12  ;;  %3644 = vmatpush.bf16.msrb.mxu3 %v5018_v20 }
 0x2fd   : > { %3619 = vmatpush.bf16.msrb.mxu1 %v5001_v61  ;;  %3632 = vmatpush.bf16.msrb.mxu2 %v5009_v23 }
 0x2fe   : > { %3658 = vmatpush.bf16.msra.mxu0 %v5025_v18  ;;  %3645 = vmatpush.bf16.msrb.mxu3 %v5017_v36 }
 0x33c   : > { %v6087_v44 = vpop.f32.mrf.mxu1 }
 0x33d   : > { %v6089_v45 = vpop.f32.mrf.mxu0 }
 0x342   : > { %v6109_v54 = vpop.f32.mrf.mxu2 }
 0x343   : > { %v6111_v55 = vpop.f32.mrf.mxu3 }
 0x344   : > { %v2837_v32 = vpop.f32.mrf.mxu1 }
 0x345   : > { %v2876_v50 = vpop.f32.mrf.mxu0 }
 0x34a   : > { %v2850_v59 = vpop.f32.mrf.mxu2 }
 0x34b   : > { %v2863_v60 = vpop.f32.mrf.mxu3 }
 0x34c   : > { %v2970_v31 = vpop.f32.mrf.mxu1 }
 0x34d   : > { %v3009_v0 = vpop.f32.mrf.mxu0  ;;  %v2971_v22 = vadd.f32 %v2970_v31, %v6087_v44 }
 0x34e   : > { %v3010_v8 = vadd.f32 %v3009_v0, %v6089_v45 }
 0x352   : > { %v2983_v7 = vpop.f32.mrf.mxu2 }
 0x353   : > { %v2996_v40 = vpop.f32.mrf.mxu3  ;;  %v2984_v27 = vadd.f32 %v2983_v7, %v6109_v54 }
 0x354   : > { %v2972_v33 = vpop.f32.mrf.mxu1  ;;  %v2997_v47 = vadd.f32 %v2996_v40, %v6111_v55 }
 0x355   : > { %v3011_v43 = vpop.f32.mrf.mxu0 }
 0x35a   : > { %v2985_v21 = vpop.f32.mrf.mxu2 }
 0x35b   : > { %v2998_v14 = vpop.f32.mrf.mxu3 }
 0x35c   : > { %v3129_v15 = vpop.f32.mrf.mxu1 }
 0x35d   : > { %v3168_v28 = vpop.f32.mrf.mxu0  ;;  %v3172_v38 = vadd.f32 %v3129_v15, %v2971_v22 }
 0x35e   : > { %v3175_v5 = vadd.f32 %v3168_v28, %v3010_v8 }
 0x362   : > { %v3142_v25 = vpop.f32.mrf.mxu2 }
 0x363   : > { %v3155_v62 = vpop.f32.mrf.mxu3  ;;  %v3173_v17 = vadd.f32 %v3142_v25, %v2984_v27 }
 0x364   : > { %v3131_v29 = vpop.f32.mrf.mxu1  ;;  %v3174_v45 = vadd.f32 %v3155_v62, %v2997_v47 }
 0x365   : > { %v3170_v26 = vpop.f32.mrf.mxu0 }
 0x36a   : > { %v3144_v37 = vpop.f32.mrf.mxu2 }
 0x36b   : > { %v3157_v13 = vpop.f32.mrf.mxu3 }
 0x36c   : > { %v3286_v39 = vpop.f32.mrf.mxu1 }
 0x36d   : > { %v3329_v41 = vadd.f32 %v3286_v39, %v3172_v38  ;;  %v3325_v42 = vpop.f32.mrf.mxu0 }
 0x36e   : > { %v3332_v10 = vadd.f32 %v3325_v42, %v3175_v5 }
 0x36f   : > { %v3343_v46 = vadd.f32 %v3335_v16, %v3329_v41 }
 0x370   : > { %v3346_v48 = vadd.f32 %v3338_v24, %v3332_v10 }
 0x371   : > { %v3347_v44 = vmax.f32 %v3343_v46, 0.0 }
 0x372   : > { %v3350_v6 = vmax.f32 %v3346_v48, 0.0  ;;  %v3299_v32 = vpop.f32.mrf.mxu2 }
 0x373   : > { %v3351_v52 = vpack.c.bf16 %v3347_v44, %v3347_v44  ;;  %v3330_v50 = vadd.f32 %v3299_v32, %v3173_v17  ;;  %v3312_v30 = vpop.f32.mrf.mxu3 }
 0x374   : > { %v3354_v53 = vpack.c.bf16 %v3350_v6, %v3350_v6  ;;  %v3331_v11 = vadd.f32 %v3312_v30, %v3174_v45  ;;  %v3288_v56 = vpop.f32.mrf.mxu1 }
 0x375   : > { %v3344_v51 = vadd.f32 %v3336_v49, %v3330_v50  ;;  %v3327_v58 = vpop.f32.mrf.mxu0  ;;  %3620 = vmatmul.bf16.vlgmr.msrb.gmra.mxu1 %v3351_v52 }
 0x376   : > { %v3345_v54 = vadd.f32 %v3337_v9, %v3331_v11  ;;  %3659 = vmatmul.bf16.vlgmr.msra.gmra.mxu0 %v3354_v53 }
 0x377   : > { %v3348_v55 = vmax.f32 %v3344_v51, 0.0 }
 0x378   : > { %v3349_v59 = vmax.f32 %v3345_v54, 0.0 }
 0x379   : > { %v3352_v60 = vpack.c.bf16 %v3348_v55, %v3348_v55 }
 0x37a   : > { %v3353_v19 = vpack.c.bf16 %v3349_v59, %v3349_v59  ;;  %v3301_v63 = vpop.f32.mrf.mxu2 }
 0x37b   : > { %v3314_v31 = vpop.f32.mrf.mxu3  ;;  %3633 = vmatmul.bf16.vlgmr.msrb.gmra.mxu2 %v3352_v60 }
 0x37c   : > { %3646 = vmatmul.bf16.vlgmr.msrb.gmra.mxu3 %v3353_v19 }
 0x3f2   : > { %v3621_v0 = vpop.f32.mrf.mxu1 }
 0x3f3   : > { %v3660_v57 = vpop.f32.mrf.mxu0  ;;  %v3622_v7 = vadd.f32 %v3621_v0, %v3419_v2 }
 0x3fa   : > { %v3623_v4 = vpop.f32.mrf.mxu1 }
 0x3fb   : > { %v3662_v12 = vpop.f32.mrf.mxu0 }
 0x3fe   : > { %v3634_v35 = vpop.f32.mrf.mxu2 }
 0x3ff   : > { %v3635_v34 = vadd.f32 %v3634_v35, %v3622_v7  ;;  %v3647_v40 = vpop.f32.mrf.mxu3 }
 0x401   : > { %v3648_v33 = vadd.f32 %v3647_v40, %v3635_v34 }
 0x403   : > { %v3661_v61 = vadd.f32 %v3660_v57, %v3648_v33 }
 0x405   : > { %v3664_v18 = vmax.f32 %v3661_v61, 0.0 }
 0x406   : > { %v3636_v43 = vpop.f32.mrf.mxu2 }
 0x407   : > { %v3665_v3 = vperm.slane %v3664_v18, 0  ;;  %v3649_v20 = vpop.f32.mrf.mxu3 }
 0x409   : > { %3666 = vst [vmem:[%s384_s12] sm:$0xff] %v3665_v3 }
 0x40a PF: > { %s21_s17 = sadd.s32 1, %s5050_s17  }
 0x40b   : > { %p18_p4 = scmp.ge.s32.totalorder %s21_s17, 4  }
 0x40d   :  { %20 = sbr.rel (!%p18_p4) target bundleno = 1 (0x1), region = 193 }

</bundles_post_ra>
